<compile_context>
chip_gen: v7x
topology: tpu7x:2x2x1
jax: 0.10.0
libtpu: 0.0.40
codegen_flags: <defaults>
</compile_context>

<pallas_src>
import functools

import jax
import jax.numpy as jnp
from jax.experimental import pallas as pl
from jax.experimental.pallas import tpu as pltpu

LANE = 128      # feature dims padded to multiples of this (lane-dense loads/stores)
SUBLANE = 8     # batch tiles padded to multiples of this


def _round_up(n, m):
    return ((n + m - 1) // m) * m


def _vmem_budget_bytes():
    """Usable VMEM budget, generation aware (v7x: 64 MiB physical, v5e/v6e: 128 MiB)."""
    try:
        cap = int(pltpu.get_tpu_info().vmem_capacity_bytes)
    except Exception:            # info query unavailable -> assume smallest (v7x) VMEM
        cap = 64 << 20
    # Leave headroom for Mosaic internal scratch / semaphores.
    return max(min(cap - (16 << 20), int(cap * 0.85)), 24 << 20)


def _choose_tm(B_pad, tm_cap):
    """Pick the batch tile.

    Goals: (a) fit the VMEM budget (tm <= tm_cap), (b) big tiles to amortize the
    ~0.35us per-grid-step overhead and feed the 256-wide MXU, (c) >=2 grid tiles for
    v7x's two TensorCores when the batch is large, (d) minimal batch padding
    (e.g. B=264 tiles as 3x128=384 rows, not 2x256=512).
    """
    tm_cap = max(SUBLANE, (tm_cap // SUBLANE) * SUBLANE)
    if B_pad <= min(tm_cap, 256):
        # Tiny/medium batch: one tile.  Splitting only adds per-step overhead on the
        # single-TC chips and this regime is weight-DMA / launch bound anyway.
        return B_pad
    cands = [t for t in (128, 256, 512, 1024) if t <= tm_cap] or [tm_cap]
    return min(cands, key=lambda t: (-(-B_pad // t) < 2, _round_up(B_pad, t), -t))


def _fused_mlp_kernel(x_ref, *refs, n_layers):
    """Whole-MLP forward for one batch tile; weights/biases are VMEM-resident.

    x_ref : (tm, in_pad0) f32
    refs  : (w0, b0, ..., w_{L-1}, b_{L-1}, o_ref)
            w_l : (in_pad_l, out_pad_l) bf16, pre-transposed + zero-padded
            b_l : (1, out_pad_l)        f32
    """
    o_ref = refs[-1]
    h = x_ref[...]                                        # f32
    for l in range(n_layers):
        w = refs[2 * l][...]                              # bf16
        b = refs[2 * l + 1][...]                          # f32
        # bf16 operands -> single MXU pass; f32 accumulation, f32 bias-add / ReLU.
        y = jnp.dot(h.astype(w.dtype), w, preferred_element_type=jnp.float32) + b
        h = jnp.maximum(y, 0.0) if l != n_layers - 1 else y
    o_ref[...] = h.astype(o_ref.dtype)                    # single lane-dense store


def fused_mlp_pallas(x_flat, padded_params, output_dim):
    """Run the whole MLP as one Pallas call.

    x_flat        : (B, F) f32 flattened input.
    padded_params : list of (wt_pad (in_pad, out_pad) bf16, b_pad (1, out_pad) f32).
    output_dim    : true (unpadded) output feature count.
    """
    B, F = x_flat.shape
    n_layers = len(padded_params)
    widths = [padded_params[0][0].shape[0]] + [w.shape[1] for w, _ in padded_params]
    in_pad0, out_pad_last = widths[0], widths[-1]
    assert F <= in_pad0, (F, in_pad0)

    budget = _vmem_budget_bytes()

    # Resident parameter bytes (single pipeline buffer thanks to pl.Buffered(1)).
    param_bytes = sum(w.size * w.dtype.itemsize + b.size * b.dtype.itemsize
                      for w, b in padded_params)
    # Per-row activation bytes: double-buffered input & output blocks (f32) plus the
    # live intermediate pair of the widest layer (f32 + bf16 copy for the dot).
    bytes_per_row = 4 * (2 * in_pad0 + 2 * out_pad_last + 3 * max(widths))

    tm_cap = max((budget - param_bytes) // bytes_per_row, SUBLANE)
    B_pad = _round_up(max(B, 1), SUBLANE)
    tm = _choose_tm(B_pad, min(tm_cap, 1024))
    B_pad = _round_up(B_pad, tm)

    est = param_bytes + tm * bytes_per_row
    # TODO(synk): stream oversized weights from HBM (pl.ANY + pltpu.emit_pipeline over K
    # with an f32 VMEM accumulator) instead of asserting.
    assert est < budget, (
        f"fused MLP working set ({est / 2**20:.1f} MiB) exceeds VMEM budget "
        f"({budget / 2**20:.1f} MiB); K/N tiling not implemented")
    vmem_limit = budget

    xp = jnp.pad(x_flat.astype(jnp.float32), ((0, B_pad - B), (0, in_pad0 - F)))
    flat_args = [xp]
    for wt, bp in padded_params:
        flat_args.extend([wt, bp])

    kernel = functools.partial(_fused_mlp_kernel, n_layers=n_layers)
    out_shape = jax.ShapeDtypeStruct((B_pad, out_pad_last), jnp.float32)

    def build_call(single_buffer_weights):
        # Constant-index weight/bias blocks stay VMEM-resident across batch tiles;
        # Buffered(1) drops the unused second pipeline buffer (halves their footprint).
        wkw = {"pipeline_mode": pl.Buffered(1)} if single_buffer_weights else {}
        in_specs = [pl.BlockSpec((tm, in_pad0), lambda i: (i, 0))]
        for wt, _bp in padded_params:
            kin, kout = wt.shape
            in_specs.append(pl.BlockSpec((kin, kout), lambda i: (0, 0), **wkw))
            in_specs.append(pl.BlockSpec((1, kout), lambda i: (0, 0), **wkw))
        return pl.pallas_call(
            kernel,
            out_shape=out_shape,
            grid=(B_pad // tm,),
            in_specs=in_specs,
            out_specs=pl.BlockSpec((tm, out_pad_last), lambda i: (i, 0)),
            compiler_params=pltpu.CompilerParams(
                dimension_semantics=("parallel",),   # v7x: batch tiles across both TCs
                vmem_limit_bytes=vmem_limit,
            ),
        )

    try:
        out_pad = build_call(True)(*flat_args)
    except Exception:
        # pl.Buffered(1) unsupported on this jax build -> default double buffering.
        out_pad = build_call(False)(*flat_args)
    return out_pad[:B, :output_dim]


def orthogonal_init(key, out_f, in_f, dtype=jnp.float32):
    """Deterministic equivalent of nn.init.orthogonal_ for an (out_f, in_f) weight."""
    rows, cols = out_f, in_f
    flat = jax.random.normal(key, (max(rows, cols), min(rows, cols)), dtype=jnp.float32)
    q, r = jnp.linalg.qr(flat)
    q = q * jnp.sign(jnp.diag(r))[None, :]
    if rows < cols:
        q = q.T
    return q[:rows, :cols].astype(dtype)


class MLPPallas:
    """JAX/Pallas port of the PyTorch MLP (batchnorm=False, ReLU, output_mod=None)."""

    def __init__(self, input_dim, hidden_dim, output_dim, hidden_depth, key):
        if hidden_depth == 0:
            dims = [(input_dim, output_dim)]
        else:
            dims = ([(input_dim, hidden_dim)]
                    + [(hidden_dim, hidden_dim)] * (hidden_depth - 1)
                    + [(hidden_dim, output_dim)])
        self.output_dim = output_dim
        self.params = []          # PyTorch-layout (out,in) W and (out,) b -- reference only
        self.padded_params = []   # (in_pad,out_pad) bf16 W^T and (1,out_pad) f32 b, zero padded
        keys = jax.random.split(key, len(dims))
        for k, (in_f, out_f) in zip(keys, dims):
            w = orthogonal_init(k, out_f, in_f)            # weight_init: orthogonal_
            b = jnp.zeros((out_f,), jnp.float32)           # weight_init: bias = 0
            self.params.append((w, b))
            in_pad, out_pad = _round_up(in_f, LANE), _round_up(out_f, LANE)
            wt_pad = (jnp.zeros((in_pad, out_pad), jnp.bfloat16)
                      .at[:in_f, :out_f].set(w.T.astype(jnp.bfloat16)))
            b_pad = jnp.zeros((1, out_pad), jnp.float32).at[0, :out_f].set(b)
            self.padded_params.append((wt_pad, b_pad))
        # TODO(synk): for tiny per-call batches, amortize weight DMA by batching several
        # inputs per call or keeping weights resident across calls (cross-call prefetch).

    def __call__(self, x):
        # nn.Flatten(1, -1): keep batch dim, flatten the rest.
        B = x.shape[0]
        return fused_mlp_pallas(x.reshape(B, -1), self.padded_params, self.output_dim)


def reference_forward(params, x, *, matmul_dtype=jnp.float32, precision=None):
    B = x.shape[0]
    h = x.reshape(B, -1).astype(jnp.float32)
    n = len(params)
    for i, (w, b) in enumerate(params):
        y = jnp.dot(h.astype(matmul_dtype), w.T.astype(matmul_dtype),
                    preferred_element_type=jnp.float32, precision=precision) + b
        h = jnp.maximum(y, 0.0) if i != n - 1 else y
    return h


if __name__ == "__main__":
    key = jax.random.PRNGKey(0)
    k_x, k_p = jax.random.split(key)

    # NCHW-like input (B=2, C=4, H=16, W=16) -> flatten -> input_dim = 1024
    B, C, H, W = 2, 4, 16, 16
    input_dim, hidden_dim, output_dim, hidden_depth = C * H * W, 256, 10, 2

    x = jax.random.normal(k_x, (B, C, H, W), jnp.float32)
    model = MLPPallas(input_dim, hidden_dim, output_dim, hidden_depth, k_p)

    out = jax.block_until_ready(model(x))
    assert out.shape == (B, output_dim), out.shape

    # Exact-path check: same bf16-operand / f32-accumulate matmuls as the kernel.
    ref_bf16 = reference_forward(model.params, x, matmul_dtype=jnp.bfloat16)
    assert jnp.allclose(out, ref_bf16, atol=2e-3, rtol=2e-3), "mismatch vs bf16 reference"

    # Semantic check vs full-f32 PyTorch-equivalent math (bf16 MXU operands trade a
    # small, bounded precision loss for 2-3x matmul throughput).
    ref_f32 = reference_forward(model.params, x, matmul_dtype=jnp.float32,
                                precision=jax.lax.Precision.HIGHEST)
    assert jnp.allclose(out, ref_f32, atol=3e-2, rtol=3e-2), "mismatch vs f32 reference"

    print("KERNEL_OK")
</pallas_src>

<mosaic_0001>
module attributes {stable_mosaic.version = 11 : i64} {
  func.func @_fused_mlp_kernel(%arg0: i32, %arg1: memref<8x1024xf32, #tpu.memory_space<vmem>>, %arg2: memref<1024x256xbf16, #tpu.memory_space<vmem>>, %arg3: memref<1x256xf32, #tpu.memory_space<vmem>>, %arg4: memref<256x256xbf16, #tpu.memory_space<vmem>>, %arg5: memref<1x256xf32, #tpu.memory_space<vmem>>, %arg6: memref<256x128xbf16, #tpu.memory_space<vmem>>, %arg7: memref<1x128xf32, #tpu.memory_space<vmem>>, %arg8: memref<8x128xf32, #tpu.memory_space<vmem>>) attributes {dimension_semantics = [#tpu.dimension_semantics<parallel>], iteration_bounds = array<i64: 1>, scalar_prefetch = 0 : i64, scratch_operands = 0 : i64, tpu.core_type = #tpu.core_type<tc>, window_params = [{transform_indices = @transform_0, window_bounds = array<i64: 8, 1024>}, {pipeline_mode = #tpu.pipeline_mode<synchronous>, transform_indices = @transform_1, window_bounds = array<i64: 1024, 256>}, {pipeline_mode = #tpu.pipeline_mode<synchronous>, transform_indices = @transform_2, window_bounds = array<i64: 1, 256>}, {pipeline_mode = #tpu.pipeline_mode<synchronous>, transform_indices = @transform_3, window_bounds = array<i64: 256, 256>}, {pipeline_mode = #tpu.pipeline_mode<synchronous>, transform_indices = @transform_4, window_bounds = array<i64: 1, 256>}, {pipeline_mode = #tpu.pipeline_mode<synchronous>, transform_indices = @transform_5, window_bounds = array<i64: 256, 128>}, {pipeline_mode = #tpu.pipeline_mode<synchronous>, transform_indices = @transform_6, window_bounds = array<i64: 1, 128>}, {transform_indices = @transform_7, window_bounds = array<i64: 8, 128>}]} {
    %c0 = arith.constant 0 : index
    %c0_0 = arith.constant 0 : index
    %0 = vector.load %arg1[%c0, %c0_0] : memref<8x1024xf32, #tpu.memory_space<vmem>>, vector<8x1024xf32>
    %c0_1 = arith.constant 0 : index
    %c0_2 = arith.constant 0 : index
    %1 = vector.load %arg2[%c0_1, %c0_2] : memref<1024x256xbf16, #tpu.memory_space<vmem>>, vector<1024x256xbf16>
    %c0_3 = arith.constant 0 : index
    %c0_4 = arith.constant 0 : index
    %2 = vector.load %arg3[%c0_3, %c0_4] : memref<1x256xf32, #tpu.memory_space<vmem>>, vector<1x256xf32>
    %3 = arith.truncf %0 : vector<8x1024xf32> to vector<8x1024xbf16>
    %cst = arith.constant dense<0.000000e+00> : vector<8x256xf32>
    %4 = tpu.matmul %3, %1, %cst {dimension_numbers = #tpu.dot_dimension_numbers<[1], [0], [0], [1], [0, 0, 1, 1], [], []>} : vector<8x1024xbf16>, vector<1024x256xbf16>, vector<8x256xf32> -> vector<8x256xf32>
    %5 = vector.broadcast %2 : vector<1x256xf32> to vector<8x256xf32>
    %6 = arith.addf %4, %5 : vector<8x256xf32>
    %cst_5 = arith.constant 0.000000e+00 : f32
    %7 = vector.broadcast %cst_5 : f32 to vector<8x256xf32>
    %8 = arith.maximumf %6, %7 : vector<8x256xf32>
    %c0_6 = arith.constant 0 : index
    %c0_7 = arith.constant 0 : index
    %9 = vector.load %arg4[%c0_6, %c0_7] : memref<256x256xbf16, #tpu.memory_space<vmem>>, vector<256x256xbf16>
    %c0_8 = arith.constant 0 : index
    %c0_9 = arith.constant 0 : index
    %10 = vector.load %arg5[%c0_8, %c0_9] : memref<1x256xf32, #tpu.memory_space<vmem>>, vector<1x256xf32>
    %11 = arith.truncf %8 : vector<8x256xf32> to vector<8x256xbf16>
    %cst_10 = arith.constant dense<0.000000e+00> : vector<8x256xf32>
    %12 = tpu.matmul %11, %9, %cst_10 {dimension_numbers = #tpu.dot_dimension_numbers<[1], [0], [0], [1], [0, 0, 1, 1], [], []>} : vector<8x256xbf16>, vector<256x256xbf16>, vector<8x256xf32> -> vector<8x256xf32>
    %13 = vector.broadcast %10 : vector<1x256xf32> to vector<8x256xf32>
    %14 = arith.addf %12, %13 : vector<8x256xf32>
    %cst_11 = arith.constant 0.000000e+00 : f32
    %15 = vector.broadcast %cst_11 : f32 to vector<8x256xf32>
    %16 = arith.maximumf %14, %15 : vector<8x256xf32>
    %c0_12 = arith.constant 0 : index
    %c0_13 = arith.constant 0 : index
    %17 = vector.load %arg6[%c0_12, %c0_13] : memref<256x128xbf16, #tpu.memory_space<vmem>>, vector<256x128xbf16>
    %c0_14 = arith.constant 0 : index
    %c0_15 = arith.constant 0 : index
    %18 = vector.load %arg7[%c0_14, %c0_15] : memref<1x128xf32, #tpu.memory_space<vmem>>, vector<1x128xf32>
    %19 = arith.truncf %16 : vector<8x256xf32> to vector<8x256xbf16>
    %cst_16 = arith.constant dense<0.000000e+00> : vector<8x128xf32>
    %20 = tpu.matmul %19, %17, %cst_16 {dimension_numbers = #tpu.dot_dimension_numbers<[1], [0], [0], [1], [0, 0, 1, 1], [], []>} : vector<8x256xbf16>, vector<256x128xbf16>, vector<8x128xf32> -> vector<8x128xf32>
    %21 = vector.broadcast %18 : vector<1x128xf32> to vector<8x128xf32>
    %22 = arith.addf %20, %21 : vector<8x128xf32>
    %c0_17 = arith.constant 0 : index
    %c0_18 = arith.constant 0 : index
    %23 = vector.load %arg8[%c0_17, %c0_18] : memref<8x128xf32, #tpu.memory_space<vmem>>, vector<8x128xf32>
    tpu.vector_store %arg8[%c0_17, %c0_18], %22 {strides = array<i32>} : memref<8x128xf32, #tpu.memory_space<vmem>>, vector<8x128xf32>,
    return
  }
  func.func @transform_0(%arg0: i32) -> (i32, i32) {
    %c0_i32 = arith.constant 0 : i32
    %c0_i32_0 = arith.constant 0 : i32
    return %arg0, %c0_i32 : i32, i32
  }
  func.func @transform_1(%arg0: i32) -> (i32, i32) {
    %c0_i32 = arith.constant 0 : i32
    %c0_i32_0 = arith.constant 0 : i32
    %c0_i32_1 = arith.constant 0 : i32
    return %c0_i32, %c0_i32_0 : i32, i32
  }
  func.func @transform_2(%arg0: i32) -> (i32, i32) {
    %c0_i32 = arith.constant 0 : i32
    %c0_i32_0 = arith.constant 0 : i32
    %c0_i32_1 = arith.constant 0 : i32
    return %c0_i32, %c0_i32_0 : i32, i32
  }
  func.func @transform_3(%arg0: i32) -> (i32, i32) {
    %c0_i32 = arith.constant 0 : i32
    %c0_i32_0 = arith.constant 0 : i32
    %c0_i32_1 = arith.constant 0 : i32
    return %c0_i32, %c0_i32_0 : i32, i32
  }
  func.func @transform_4(%arg0: i32) -> (i32, i32) {
    %c0_i32 = arith.constant 0 : i32
    %c0_i32_0 = arith.constant 0 : i32
    %c0_i32_1 = arith.constant 0 : i32
    return %c0_i32, %c0_i32_0 : i32, i32
  }
  func.func @transform_5(%arg0: i32) -> (i32, i32) {
    %c0_i32 = arith.constant 0 : i32
    %c0_i32_0 = arith.constant 0 : i32
    %c0_i32_1 = arith.constant 0 : i32
    return %c0_i32, %c0_i32_0 : i32, i32
  }
  func.func @transform_6(%arg0: i32) -> (i32, i32) {
    %c0_i32 = arith.constant 0 : i32
    %c0_i32_0 = arith.constant 0 : i32
    %c0_i32_1 = arith.constant 0 : i32
    return %c0_i32, %c0_i32_0 : i32, i32
  }
  func.func @transform_7(%arg0: i32) -> (i32, i32) {
    %c0_i32 = arith.constant 0 : i32
    %c0_i32_0 = arith.constant 0 : i32
    return %arg0, %c0_i32 : i32, i32
  }
}

module attributes {stable_mosaic.version = 11 : i64} {
  func.func @_fused_mlp_kernel(%arg0: i32, %arg1: memref<8x1024xf32, #tpu.memory_space<vmem>>, %arg2: memref<1024x256xbf16, #tpu.memory_space<vmem>>, %arg3: memref<1x256xf32, #tpu.memory_space<vmem>>, %arg4: memref<256x256xbf16, #tpu.memory_space<vmem>>, %arg5: memref<1x256xf32, #tpu.memory_space<vmem>>, %arg6: memref<256x128xbf16, #tpu.memory_space<vmem>>, %arg7: memref<1x128xf32, #tpu.memory_space<vmem>>, %arg8: memref<8x128xf32, #tpu.memory_space<vmem>>) attributes {dimension_semantics = [#tpu.dimension_semantics<parallel>], iteration_bounds = array<i64: 1>, scalar_prefetch = 0 : i64, scratch_operands = 0 : i64, tpu.core_type = #tpu.core_type<tc>, window_params = [{transform_indices = @transform_0, window_bounds = array<i64: 8, 1024>}, {pipeline_mode = #tpu.pipeline_mode<synchronous>, transform_indices = @transform_1, window_bounds = array<i64: 1024, 256>}, {pipeline_mode = #tpu.pipeline_mode<synchronous>, transform_indices = @transform_2, window_bounds = array<i64: 1, 256>}, {pipeline_mode = #tpu.pipeline_mode<synchronous>, transform_indices = @transform_3, window_bounds = array<i64: 256, 256>}, {pipeline_mode = #tpu.pipeline_mode<synchronous>, transform_indices = @transform_4, window_bounds = array<i64: 1, 256>}, {pipeline_mode = #tpu.pipeline_mode<synchronous>, transform_indices = @transform_5, window_bounds = array<i64: 256, 128>}, {pipeline_mode = #tpu.pipeline_mode<synchronous>, transform_indices = @transform_6, window_bounds = array<i64: 1, 128>}, {transform_indices = @transform_7, window_bounds = array<i64: 8, 128>}]} {
    %c0 = arith.constant 0 : index
    %c0_0 = arith.constant 0 : index
    %0 = vector.load %arg1[%c0, %c0_0] : memref<8x1024xf32, #tpu.memory_space<vmem>>, vector<8x1024xf32>
    %c0_1 = arith.constant 0 : index
    %c0_2 = arith.constant 0 : index
    %1 = vector.load %arg2[%c0_1, %c0_2] : memref<1024x256xbf16, #tpu.memory_space<vmem>>, vector<1024x256xbf16>
    %c0_3 = arith.constant 0 : index
    %c0_4 = arith.constant 0 : index
    %2 = vector.load %arg3[%c0_3, %c0_4] : memref<1x256xf32, #tpu.memory_space<vmem>>, vector<1x256xf32>
    %3 = arith.truncf %0 : vector<8x1024xf32> to vector<8x1024xbf16>
    %cst = arith.constant dense<0.000000e+00> : vector<8x256xf32>
    %4 = tpu.matmul %3, %1, %cst {dimension_numbers = #tpu.dot_dimension_numbers<[1], [0], [0], [1], [0, 0, 1, 1], [], []>} : vector<8x1024xbf16>, vector<1024x256xbf16>, vector<8x256xf32> -> vector<8x256xf32>
    %5 = vector.broadcast %2 : vector<1x256xf32> to vector<8x256xf32>
    %6 = arith.addf %4, %5 : vector<8x256xf32>
    %cst_5 = arith.constant 0.000000e+00 : f32
    %7 = vector.broadcast %cst_5 : f32 to vector<8x256xf32>
    %8 = arith.maximumf %6, %7 : vector<8x256xf32>
    %c0_6 = arith.constant 0 : index
    %c0_7 = arith.constant 0 : index
    %9 = vector.load %arg4[%c0_6, %c0_7] : memref<256x256xbf16, #tpu.memory_space<vmem>>, vector<256x256xbf16>
    %c0_8 = arith.constant 0 : index
    %c0_9 = arith.constant 0 : index
    %10 = vector.load %arg5[%c0_8, %c0_9] : memref<1x256xf32, #tpu.memory_space<vmem>>, vector<1x256xf32>
    %11 = arith.truncf %8 : vector<8x256xf32> to vector<8x256xbf16>
    %cst_10 = arith.constant dense<0.000000e+00> : vector<8x256xf32>
    %12 = tpu.matmul %11, %9, %cst_10 {dimension_numbers = #tpu.dot_dimension_numbers<[1], [0], [0], [1], [0, 0, 1, 1], [], []>} : vector<8x256xbf16>, vector<256x256xbf16>, vector<8x256xf32> -> vector<8x256xf32>
    %13 = vector.broadcast %10 : vector<1x256xf32> to vector<8x256xf32>
    %14 = arith.addf %12, %13 : vector<8x256xf32>
    %cst_11 = arith.constant 0.000000e+00 : f32
    %15 = vector.broadcast %cst_11 : f32 to vector<8x256xf32>
    %16 = arith.maximumf %14, %15 : vector<8x256xf32>
    %c0_12 = arith.constant 0 : index
    %c0_13 = arith.constant 0 : index
    %17 = vector.load %arg6[%c0_12, %c0_13] : memref<256x128xbf16, #tpu.memory_space<vmem>>, vector<256x128xbf16>
    %c0_14 = arith.constant 0 : index
    %c0_15 = arith.constant 0 : index
    %18 = vector.load %arg7[%c0_14, %c0_15] : memref<1x128xf32, #tpu.memory_space<vmem>>, vector<1x128xf32>
    %19 = arith.truncf %16 : vector<8x256xf32> to vector<8x256xbf16>
    %cst_16 = arith.constant dense<0.000000e+00> : vector<8x128xf32>
    %20 = tpu.matmul %19, %17, %cst_16 {dimension_numbers = #tpu.dot_dimension_numbers<[1], [0], [0], [1], [0, 0, 1, 1], [], []>} : vector<8x256xbf16>, vector<256x128xbf16>, vector<8x128xf32> -> vector<8x128xf32>
    %21 = vector.broadcast %18 : vector<1x128xf32> to vector<8x128xf32>
    %22 = arith.addf %20, %21 : vector<8x128xf32>
    %c0_17 = arith.constant 0 : index
    %c0_18 = arith.constant 0 : index
    %23 = vector.load %arg8[%c0_17, %c0_18] : memref<8x128xf32, #tpu.memory_space<vmem>>, vector<8x128xf32>
    tpu.vector_store %arg8[%c0_17, %c0_18], %22 {strides = array<i32>} : memref<8x128xf32, #tpu.memory_space<vmem>>, vector<8x128xf32>,
    return
  }
  func.func @transform_0(%arg0: i32) -> (i32, i32) {
    %c0_i32 = arith.constant 0 : i32
    %c0_i32_0 = arith.constant 0 : i32
    return %arg0, %c0_i32 : i32, i32
  }
  func.func @transform_1(%arg0: i32) -> (i32, i32) {
    %c0_i32 = arith.constant 0 : i32
    %c0_i32_0 = arith.constant 0 : i32
    %c0_i32_1 = arith.constant 0 : i32
    return %c0_i32, %c0_i32_0 : i32, i32
  }
  func.func @transform_2(%arg0: i32) -> (i32, i32) {
    %c0_i32 = arith.constant 0 : i32
    %c0_i32_0 = arith.constant 0 : i32
    %c0_i32_1 = arith.constant 0 : i32
    return %c0_i32, %c0_i32_0 : i32, i32
  }
  func.func @transform_3(%arg0: i32) -> (i32, i32) {
    %c0_i32 = arith.constant 0 : i32
    %c0_i32_0 = arith.constant 0 : i32
    %c0_i32_1 = arith.constant 0 : i32
    return %c0_i32, %c0_i32_0 : i32, i32
  }
  func.func @transform_4(%arg0: i32) -> (i32, i32) {
    %c0_i32 = arith.constant 0 : i32
    %c0_i32_0 = arith.constant 0 : i32
    %c0_i32_1 = arith.constant 0 : i32
    return %c0_i32, %c0_i32_0 : i32, i32
  }
  func.func @transform_5(%arg0: i32) -> (i32, i32) {
    %c0_i32 = arith.constant 0 : i32
    %c0_i32_0 = arith.constant 0 : i32
    %c0_i32_1 = arith.constant 0 : i32
    return %c0_i32, %c0_i32_0 : i32, i32
  }
  func.func @transform_6(%arg0: i32) -> (i32, i32) {
    %c0_i32 = arith.constant 0 : i32
    %c0_i32_0 = arith.constant 0 : i32
    %c0_i32_1 = arith.constant 0 : i32
    return %c0_i32, %c0_i32_0 : i32, i32
  }
  func.func @transform_7(%arg0: i32) -> (i32, i32) {
    %c0_i32 = arith.constant 0 : i32
    %c0_i32_0 = arith.constant 0 : i32
    return %arg0, %c0_i32 : i32, i32
  }
}

</mosaic_0001>

<bundles_post_ra>
// kernel: tpu_custom_call.1
= control target key start
LH: loop header
LB: loop body
LE: loop exit
PB: predicated region body
PF: predicated region fallthrough
CT: control target
= control target key end

     0   :  { %12 = vsyncpa [#allocation3], 0  ;;  %s2205_s0 = inlined_call_operand.hbm [shape: f32[8,1024], index: 0, kind: input, shape index: {}]   ;;  %s2206_s1 = inlined_call_operand.hbm [shape: bf16[1024,256], index: 1, kind: input, shape index: {}]   ;;  %s2207_s2 = inlined_call_operand.vmem [shape: f32[1,256], index: 2, kind: input, shape index: {}]   ;;  %s2208_s3 = inlined_call_operand.hbm [shape: bf16[256,256], index: 3, kind: input, shape index: {}]   ;;  %s2209_s4 = inlined_call_operand.vmem [shape: f32[1,256], index: 4, kind: input, shape index: {}]   ;;  %s2210_s5 = inlined_call_operand.hbm [shape: bf16[256,128], index: 5, kind: input, shape index: {}]   ;;  %s2211_s6 = inlined_call_operand.vmem [shape: f32[1,128], index: 6, kind: input, shape index: {}]   ;;  %s2212_s7 = inlined_call_operand.hbm [shape: f32[8,128], index: 7, kind: output, shape index: {}]  }
   0x1   :  { %13 = vsyncpa [#allocation6], 0 }
   0x2   :  { %14 = vsyncpa [#allocation9], 0 }
   0x3   :  { %15 = vsyncpa [#allocation4], 0  ;;  %s2081_s24 = smov [#allocation5]   ;;  %s1963_s28 = scalar_lea.hbm %s2206_s1, 16384 }
   0x4   :  { %s31_s25 = sshll.u32 %s2081_s24, 4  ;;  %p1964_p0 = scmp.ne.s32.totalorder %s2206_s1, %s1963_s28  ;;  %s32_s25 = int_to_ptr.vmem [resolvable:$true] %s31_s25 }
   0x5   :  { %p1967_p1 = scmp.lt.u32.totalorder %s1963_s28, %s2206_s1 }
   0x7   :  { %p1969_p2 = pnand %p1967_p1, %p1964_p0 }
   0x9   :  { %1972 = shalt.err (!%p1969_p2)
}
   0xa   :  { %s1973_s10 = scalar_lea.vmem %s32_s25, 16384  ;;  %p1978_p4 = scmp.lt.s32.totalorder %s32_s25, %s32_s25 }
   0xb   :  { %p1974_p3 = scmp.ne.s32.totalorder %s32_s25, %s1973_s10  ;;  %p1979_p5 = scmp.lt.s32.totalorder %s1973_s10, %s1973_s10 }
   0xd   :  { %p1980_p6 = por %p1979_p5, %p1978_p4 }
   0xf   :  { %p1981_p7 = pnand %p1980_p6, %p1974_p3 }
  0x11   :  { %1984 = shalt.err (!%p1981_p7)
}
  0x12   :  { %s2082_s11 = smov 128   ;;  %s2083_s12 = smov 8  }
  0x13   :  { %37 = dma.hbm_to_vmem [thread:$0]  %s2206_s1, 16384, %s32_s25, [#allocation6], %s2082_s11, %s2082_s11, %s2083_s12  }
  0x14   :  { %s2084_s15 = smov [#allocation2]   ;;  %s2085_s17 = smov [#allocation7]  }
  0x15   :  { %s22_s16 = sshll.u32 %s2084_s15, 4  ;;  %s45_s18 = sshll.u32 %s2085_s17, 4  ;;  %s23_s16 = int_to_ptr.vmem [resolvable:$true] %s22_s16  ;;  %s46_s18 = int_to_ptr.vmem [resolvable:$true] %s45_s18 }
  0x16   :  { %s1985_s21 = scalar_lea.hbm %s2205_s0, 1024 }
  0x17   :  { %p1986_p8 = scmp.ne.s32.totalorder %s2205_s0, %s1985_s21  ;;  %p1989_p9 = scmp.lt.u32.totalorder %s1985_s21, %s2205_s0 }
  0x19   :  { %p1991_p10 = pnand %p1989_p9, %p1986_p8 }
  0x1b   :  { %1994 = shalt.err (!%p1991_p10)
}
  0x1c   :  { %s1995_s1 = scalar_lea.vmem %s23_s16, 1024  ;;  %p2000_p12 = scmp.lt.s32.totalorder %s23_s16, %s23_s16 }
  0x1d   :  { %p1996_p11 = scmp.ne.s32.totalorder %s23_s16, %s1995_s1  ;;  %p2001_p13 = scmp.lt.s32.totalorder %s1995_s1, %s1995_s1 }
  0x1f   :  { %p2002_p0 = por %p2001_p13, %p2000_p12 }
  0x21   :  { %p2003_p1 = pnand %p2002_p0, %p1996_p11 }
  0x23   :  { %2006 = shalt.err (!%p2003_p1)
}
  0x24   :  { %25 = dma.hbm_to_vmem [thread:$0]  %s2205_s0, 1024, %s23_s16, [#allocation3]  }
  0x25   :  { %s2007_s30 = scalar_lea.hbm %s2208_s3, 4096 }
  0x26   :  { %p2008_p2 = scmp.ne.s32.totalorder %s2208_s3, %s2007_s30  ;;  %p2011_p3 = scmp.lt.u32.totalorder %s2007_s30, %s2208_s3 }
  0x28   :  { %p2013_p4 = pnand %p2011_p3, %p2008_p2 }
  0x2a   :  { %2016 = shalt.err (!%p2013_p4)
}
  0x2b   :  { %s2017_s14 = scalar_lea.vmem %s46_s18, 4096  ;;  %p2022_p6 = scmp.lt.s32.totalorder %s46_s18, %s46_s18 }
  0x2c   :  { %p2018_p5 = scmp.ne.s32.totalorder %s46_s18, %s2017_s14  ;;  %p2023_p7 = scmp.lt.s32.totalorder %s2017_s14, %s2017_s14 }
  0x2e   :  { %p2024_p8 = por %p2023_p7, %p2022_p6 }
  0x30   :  { %p2025_p9 = pnand %p2024_p8, %p2018_p5 }
  0x32   :  { %2028 = shalt.err (!%p2025_p9)
}
  0x33   :  { %51 = dma.hbm_to_vmem [thread:$0]  %s2208_s3, 4096, %s46_s18, [#allocation6], %s2082_s11, %s2082_s11, %s2083_s12  }
  0x34   :  { %s2086_s16 = smov [#allocation8]   ;;  %s2029_s21 = scalar_lea.hbm %s2210_s5, 2048 }
  0x35   :  { %s59_s17 = sshll.u32 %s2086_s16, 4  ;;  %p2030_p10 = scmp.ne.s32.totalorder %s2210_s5, %s2029_s21  ;;  %s60_s17 = int_to_ptr.vmem [resolvable:$true] %s59_s17 }
  0x36   :  { %p2033_p11 = scmp.lt.u32.totalorder %s2029_s21, %s2210_s5 }
  0x38   :  { %p2035_p12 = pnand %p2033_p11, %p2030_p10 }
  0x3a   :  { %2038 = shalt.err (!%p2035_p12)
}
  0x3b   :  { %s2039_s1 = scalar_lea.vmem %s60_s17, 2048  ;;  %p2044_p0 = scmp.lt.s32.totalorder %s60_s17, %s60_s17 }
  0x3c   :  { %p2040_p13 = scmp.ne.s32.totalorder %s60_s17, %s2039_s1  ;;  %p2045_p1 = scmp.lt.s32.totalorder %s2039_s1, %s2039_s1 }
  0x3e   :  { %p2046_p2 = por %p2045_p1, %p2044_p0 }
  0x40   :  { %p2047_p3 = pnand %p2046_p2, %p2040_p13 }
  0x42   :  { %2050 = shalt.err (!%p2047_p3)
}
  0x43   :  { %s2087_s3 = smov 64   ;;  %s2088_s11 = smov 4  }
  0x44   :  { %65 = dma.hbm_to_vmem [thread:$0]  %s2210_s5, 2048, %s60_s17, [#allocation9], %s2087_s3, %s2087_s3, %s2088_s11  }
  0x45   :  { %2073 = dma.done.wait [#allocation3], 1024  }
  0x46   :  { %2074 = vsyncadd [#allocation3], 4294966272 }
  0x47   :  { %2075 = dma.done.wait [#allocation6], 20480  }
  0x48   :  { %2076 = vsyncadd [#allocation6], 4294946816 }
  0x49   :  { %2077 = dma.done.wait [#allocation9], 2048  }
  0x4a   :  { %2078 = vsyncadd [#allocation9], 4294965248  ;;  %v1707_v0 = vld [vmem:[#allocation5 + $0x104] ss:$8 sps:$4 sm:$0xff]   ;;  %v1709_v1 = vld [vmem:[#allocation5 + $0x100] ss:$8 sps:$4 sm:$0xff]  }
  0x4b   :  { %918 = vmatprep.subr.bf16.mxu0 %v1707_v0  ;;  %v1710_v2 = vld [vmem:[#allocation5 + $0x114] ss:$8 sps:$4 sm:$0xff]   ;;  %v1712_v3 = vld [vmem:[#allocation5 + $0x110] ss:$8 sps:$4 sm:$0xff]   ;;  %v1713_v4 = vld [vmem:[#allocation5 + $0x124] ss:$8 sps:$4 sm:$0xff]  }
  0x4c   :  { %919 = vmatpush1.bf16.msra.mxu0 %v1709_v1  ;;  %v1715_v5 = vld [vmem:[#allocation5 + $0x120] ss:$8 sps:$4 sm:$0xff]   ;;  %v1716_v6 = vld [vmem:[#allocation5 + $0x134] ss:$8 sps:$4 sm:$0xff]   ;;  %v1718_v7 = vld [vmem:[#allocation5 + $0x130] ss:$8 sps:$4 sm:$0xff]  }
  0x4d   :  { %920 = vmatprep.subr.bf16.mxu0 %v1710_v2  ;;  %v1719_v8 = vld [vmem:[#allocation5 + $0x144] ss:$8 sps:$4 sm:$0xff]   ;;  %v1721_v9 = vld [vmem:[#allocation5 + $0x140] ss:$8 sps:$4 sm:$0xff]   ;;  %v1722_v10 = vld [vmem:[#allocation5 + $0x154] ss:$8 sps:$4 sm:$0xff]  }
  0x4e   :  { %v1724_v11 = vld [vmem:[#allocation5 + $0x150] ss:$8 sps:$4 sm:$0xff]   ;;  %v1725_v12 = vld [vmem:[#allocation5 + $0x164] ss:$8 sps:$4 sm:$0xff]   ;;  %v1727_v15 = vld [vmem:[#allocation5 + $0x160] ss:$8 sps:$4 sm:$0xff]  }
  0x4f   :  { %v84_v13 = vld [vmem:[#allocation2 + $0x18] sm:$0xff]  ;;  %v1731_v18 = vld [vmem:[#allocation5 + $0x184] ss:$8 sps:$4 sm:$0xff]   ;;  %v1733_v19 = vld [vmem:[#allocation5 + $0x180] ss:$8 sps:$4 sm:$0xff]  }
  0x50   :  { %921 = vmatpush1.bf16.msra.mxu0 %v1712_v3  ;;  %v221_v14 = vpack.c.bf16 %v84_v13, %v84_v13  ;;  %v1728_v16 = vld [vmem:[#allocation5 + $0x174] ss:$8 sps:$4 sm:$0xff]   ;;  %v1730_v17 = vld [vmem:[#allocation5 + $0x170] ss:$8 sps:$4 sm:$0xff]   ;;  %v1737_v22 = vld [vmem:[#allocation5 + $0x1a4] ss:$8 sps:$4 sm:$0xff]  }
  0x51   :  { %922 = vmatprep.subr.bf16.mxu0 %v1713_v4  ;;  %v1734_v20 = vld [vmem:[#allocation5 + $0x194] ss:$8 sps:$4 sm:$0xff]   ;;  %v1736_v21 = vld [vmem:[#allocation5 + $0x190] ss:$8 sps:$4 sm:$0xff]   ;;  %v1739_v23 = vld [vmem:[#allocation5 + $0x1a0] ss:$8 sps:$4 sm:$0xff]  }
  0x52   :  { %950 = vmatprep.mubr.bf16.mxu0 %v221_v14  ;;  %v1740_v24 = vld [vmem:[#allocation5 + $0x1b4] ss:$8 sps:$4 sm:$0xff]   ;;  %v1742_v25 = vld [vmem:[#allocation5 + $0x1b0] ss:$8 sps:$4 sm:$0xff]   ;;  %v1800_v26 = vld [vmem:[#allocation5 + $0x4] ss:$8 sps:$4 sm:$0xff]  }
  0x53   :  { %v1802_v27 = vld [vmem:[#allocation5] ss:$8 sps:$4 sm:$0xff]   ;;  %v1743_v28 = vld [vmem:[#allocation5 + $0x1c4] ss:$8 sps:$4 sm:$0xff]   ;;  %877 = vmatprep.subr.bf16.mxu1 %v1800_v26  ;;  %v1806_v29 = vld [vmem:[#allocation5 + $0x14] ss:$8 sps:$4 sm:$0xff]  }
  0x54   :  { %923 = vmatpush1.bf16.msra.mxu0 %v1715_v5  ;;  %878 = vmatpush1.bf16.msra.mxu1 %v1802_v27  ;;  %v1808_v30 = vld [vmem:[#allocation5 + $0x10] ss:$8 sps:$4 sm:$0xff]   ;;  %v1745_v31 = vld [vmem:[#allocation5 + $0x1c0] ss:$8 sps:$4 sm:$0xff]   ;;  %v1746_v32 = vld [vmem:[#allocation5 + $0x1d4] ss:$8 sps:$4 sm:$0xff]  }
  0x55   :  { %924 = vmatprep.subr.bf16.mxu0 %v1716_v6  ;;  %879 = vmatprep.subr.bf16.mxu1 %v1806_v29  ;;  %v1812_v33 = vld [vmem:[#allocation5 + $0x24] ss:$8 sps:$4 sm:$0xff]   ;;  %v1814_v34 = vld [vmem:[#allocation5 + $0x20] ss:$8 sps:$4 sm:$0xff]   ;;  %v1748_v35 = vld [vmem:[#allocation5 + $0x1d0] ss:$8 sps:$4 sm:$0xff]  }
  0x56   :  { %v1818_v36 = vld [vmem:[#allocation5 + $0x34] ss:$8 sps:$4 sm:$0xff]   ;;  %v1749_v37 = vld [vmem:[#allocation5 + $0x1e4] ss:$8 sps:$4 sm:$0xff]   ;;  %v1820_v38 = vld [vmem:[#allocation5 + $0x30] ss:$8 sps:$4 sm:$0xff]  }
  0x57   :  { %v1824_v39 = vld [vmem:[#allocation5 + $0x44] ss:$8 sps:$4 sm:$0xff]   ;;  %v1751_v40 = vld [vmem:[#allocation5 + $0x1e0] ss:$8 sps:$4 sm:$0xff]   ;;  %v1752_v41 = vld [vmem:[#allocation5 + $0x1f4] ss:$8 sps:$4 sm:$0xff]  }
  0x58   :  { %925 = vmatpush1.bf16.msra.mxu0 %v1718_v7  ;;  %880 = vmatpush1.bf16.msra.mxu1 %v1808_v30  ;;  %v1826_v42 = vld [vmem:[#allocation5 + $0x40] ss:$8 sps:$4 sm:$0xff]   ;;  %v1754_v43 = vld [vmem:[#allocation5 + $0x1f0] ss:$8 sps:$4 sm:$0xff]   ;;  %v1830_v44 = vld [vmem:[#allocation5 + $0x54] ss:$8 sps:$4 sm:$0xff]  }
  0x59   :  { %926 = vmatprep.subr.bf16.mxu0 %v1719_v8  ;;  %881 = vmatprep.subr.bf16.mxu1 %v1812_v33  ;;  %v1757_v45 = vld [vmem:[#allocation5 + $0x204] ss:$8 sps:$4 sm:$0xff]   ;;  %v83_v46 = vld [vmem:[#allocation2 + $0x10] sm:$0xff]  ;;  %v1755_v51 = vld [vmem:[#allocation5 + $0x200] ss:$8 sps:$4 sm:$0xff]  }
  0x5a   :  { %v86_v47 = vld [vmem:[#allocation2 + $0x28] sm:$0xff]  ;;  %v1832_v48 = vld [vmem:[#allocation5 + $0x50] ss:$8 sps:$4 sm:$0xff]   ;;  %v220_v49 = vpack.c.bf16 %v83_v46, %v83_v46  ;;  %v1760_v53 = vld [vmem:[#allocation5 + $0x214] ss:$8 sps:$4 sm:$0xff]  }
  0x5b   :  { %v1836_v50 = vld [vmem:[#allocation5 + $0x64] ss:$8 sps:$4 sm:$0xff]   ;;  %v223_v52 = vpack.c.bf16 %v86_v47, %v86_v47  ;;  %v1838_v54 = vld [vmem:[#allocation5 + $0x60] ss:$8 sps:$4 sm:$0xff]   ;;  %v1842_v55 = vld [vmem:[#allocation5 + $0x74] ss:$8 sps:$4 sm:$0xff]  }
  0x5c   :  { %927 = vmatpush1.bf16.msra.mxu0 %v1721_v9  ;;  %882 = vmatpush1.bf16.msra.mxu1 %v1814_v34  ;;  %v1758_v56 = vld [vmem:[#allocation5 + $0x210] ss:$8 sps:$4 sm:$0xff]   ;;  %v1763_v57 = vld [vmem:[#allocation5 + $0x224] ss:$8 sps:$4 sm:$0xff]   ;;  %v1761_v60 = vld [vmem:[#allocation5 + $0x220] ss:$8 sps:$4 sm:$0xff]  }
  0x5d   :  { %928 = vmatprep.subr.bf16.mxu0 %v1722_v10  ;;  %883 = vmatprep.subr.bf16.mxu1 %v1818_v36  ;;  %v1844_v58 = vld [vmem:[#allocation5 + $0x70] ss:$8 sps:$4 sm:$0xff]   ;;  %v1848_v59 = vld [vmem:[#allocation5 + $0x84] ss:$8 sps:$4 sm:$0xff]   ;;  %v1766_v61 = vld [vmem:[#allocation5 + $0x234] ss:$8 sps:$4 sm:$0xff]  }
  0x5e   :  { %v1850_v62 = vld [vmem:[#allocation5 + $0x80] ss:$8 sps:$4 sm:$0xff]   ;;  %v1854_v63 = vld [vmem:[#allocation5 + $0x94] ss:$8 sps:$4 sm:$0xff]   ;;  %v1764_v0 = vld [vmem:[#allocation5 + $0x230] ss:$8 sps:$4 sm:$0xff]  }
  0x5f   :  { %v1769_v1 = vld [vmem:[#allocation5 + $0x244] ss:$8 sps:$4 sm:$0xff]   ;;  %v1856_v2 = vld [vmem:[#allocation5 + $0x90] ss:$8 sps:$4 sm:$0xff]   ;;  %v1767_v4 = vld [vmem:[#allocation5 + $0x240] ss:$8 sps:$4 sm:$0xff]  }
  0x60   :  { %929 = vmatpush1.bf16.msra.mxu0 %v1724_v11  ;;  %884 = vmatpush1.bf16.msra.mxu1 %v1820_v38  ;;  %v1860_v3 = vld [vmem:[#allocation5 + $0xa4] ss:$8 sps:$4 sm:$0xff]   ;;  %v1772_v5 = vld [vmem:[#allocation5 + $0x254] ss:$8 sps:$4 sm:$0xff]   ;;  %v1862_v6 = vld [vmem:[#allocation5 + $0xa0] ss:$8 sps:$4 sm:$0xff]  }
  0x61   :  { %930 = vmatprep.subr.bf16.mxu0 %v1725_v12  ;;  %885 = vmatprep.subr.bf16.mxu1 %v1824_v39  ;;  %v1866_v7 = vld [vmem:[#allocation5 + $0xb4] ss:$8 sps:$4 sm:$0xff]   ;;  %v1770_v8 = vld [vmem:[#allocation5 + $0x250] ss:$8 sps:$4 sm:$0xff]   ;;  %v1775_v9 = vld [vmem:[#allocation5 + $0x264] ss:$8 sps:$4 sm:$0xff]  }
  0x62   :  { %v1868_v10 = vld [vmem:[#allocation5 + $0xb0] ss:$8 sps:$4 sm:$0xff]   ;;  %v82_v11 = vld [vmem:[#allocation2 + $0x8] sm:$0xff]  ;;  %v81_v29 = vld [vmem:[#allocation2] sm:$0xff] }
  0x63   :  { %v1872_v12 = vld [vmem:[#allocation5 + $0xc4] ss:$8 sps:$4 sm:$0xff]   ;;  %v219_v13 = vpack.c.bf16 %v82_v11, %v82_v11  ;;  %v1773_v14 = vld [vmem:[#allocation5 + $0x260] ss:$8 sps:$4 sm:$0xff]   ;;  %v1782_v26 = vld [vmem:[#allocation5 + $0x290] ss:$8 sps:$4 sm:$0xff]   ;;  %v218_v33 = vpack.c.bf16 %v81_v29, %v81_v29 }
  0x64   :  { %931 = vmatpush1.bf16.msra.mxu0 %v1727_v15  ;;  %886 = vmatpush1.bf16.msra.mxu1 %v1826_v42  ;;  %v1778_v15 = vld [vmem:[#allocation5 + $0x274] ss:$8 sps:$4 sm:$0xff]   ;;  %v1787_v27 = vld [vmem:[#allocation5 + $0x2a4] ss:$8 sps:$4 sm:$0xff]   ;;  %v1788_v34 = vld [vmem:[#allocation5 + $0x2b0] ss:$8 sps:$4 sm:$0xff]  }
  0x65   :  { %932 = vmatprep.subr.bf16.mxu0 %v1728_v16  ;;  %887 = vmatprep.subr.bf16.mxu1 %v1830_v44  ;;  %v1874_v16 = vld [vmem:[#allocation5 + $0xc0] ss:$8 sps:$4 sm:$0xff]   ;;  %v1901_v30 = vld [vmem:[#allocation7 + $0x4] ss:$8 sps:$4 sm:$0xff]   ;;  %v1904_v36 = vld [vmem:[#allocation7 + $0x14] ss:$8 sps:$4 sm:$0xff]  }
  0x66   :  { %909 = vmatprep.mubr.bf16.mxu1 %v219_v13  ;;  %v1902_v38 = vld [vmem:[#allocation7 + $0x10] ss:$8 sps:$4 sm:$0xff]   ;;  %v1907_v39 = vld [vmem:[#allocation7 + $0x24] ss:$8 sps:$4 sm:$0xff]   ;;  %v1905_v42 = vld [vmem:[#allocation7 + $0x20] ss:$8 sps:$4 sm:$0xff]  }
  0x67   :  { %v1794_v44 = vld [vmem:[#allocation5 + $0x2d0] ss:$8 sps:$4 sm:$0xff]   ;;  %v1913_v47 = vld [vmem:[#allocation7 + $0x44] ss:$8 sps:$4 sm:$0xff]   ;;  %v1841_v13 = vld [vmem:[#allocation5 + $0x354] ss:$8 sps:$4 sm:$0xff]  }
  0x68   :  { %933 = vmatpush1.bf16.msra.mxu0 %v1730_v17  ;;  %888 = vmatpush1.bf16.msra.mxu1 %v1832_v48  ;;  %v1878_v17 = vld [vmem:[#allocation5 + $0xd4] ss:$8 sps:$4 sm:$0xff]   ;;  %v1908_v46 = vld [vmem:[#allocation7 + $0x30] ss:$8 sps:$4 sm:$0xff]   ;;  %v1797_v48 = vld [vmem:[#allocation5 + $0x2e0] ss:$8 sps:$4 sm:$0xff]  }
  0x69   :  { %934 = vmatprep.subr.bf16.mxu0 %v1731_v18  ;;  %889 = vmatprep.subr.bf16.mxu1 %v1836_v50  ;;  %v1776_v18 = vld [vmem:[#allocation5 + $0x270] ss:$8 sps:$4 sm:$0xff]   ;;  %v1911_v50 = vld [vmem:[#allocation7 + $0x40] ss:$8 sps:$4 sm:$0xff]   ;;  %v1931_v11 = vld [vmem:[#allocation7 + $0xa4] ss:$8 sps:$4 sm:$0xff]  }
  0x6a   :  { %v1869_v29 = vld [vmem:[#allocation5 + $0x3a0] ss:$8 sps:$4 sm:$0xff]  }
  0x6c   :  { %935 = vmatpush1.bf16.msra.mxu0 %v1733_v19  ;;  %890 = vmatpush1.bf16.msra.mxu1 %v1838_v54  ;;  %v1781_v19 = vld [vmem:[#allocation5 + $0x284] ss:$8 sps:$4 sm:$0xff]  }
  0x6d   :  { %936 = vmatprep.subr.bf16.mxu0 %v1734_v20  ;;  %891 = vmatprep.subr.bf16.mxu1 %v1842_v55  ;;  %v1880_v20 = vld [vmem:[#allocation5 + $0xd0] ss:$8 sps:$4 sm:$0xff]   ;;  %v1811_v54 = vld [vmem:[#allocation5 + $0x304] ss:$8 sps:$4 sm:$0xff]  }
  0x6e   :  { %v88_v55 = vld [vmem:[#allocation2 + $0x38] sm:$0xff] }
  0x70   :  { %937 = vmatpush1.bf16.msra.mxu0 %v1736_v21  ;;  %892 = vmatpush1.bf16.msra.mxu1 %v1844_v58  ;;  %v1884_v21 = vld [vmem:[#allocation5 + $0xe4] ss:$8 sps:$4 sm:$0xff]  }
  0x71   :  { %938 = vmatprep.subr.bf16.mxu0 %v1737_v22  ;;  %893 = vmatprep.subr.bf16.mxu1 %v1848_v59  ;;  %v1779_v22 = vld [vmem:[#allocation5 + $0x280] ss:$8 sps:$4 sm:$0xff]   ;;  %v1919_v58 = vld [vmem:[#allocation7 + $0x64] ss:$8 sps:$4 sm:$0xff]  }
  0x72   :  { %v1809_v59 = vld [vmem:[#allocation5 + $0x300] ss:$8 sps:$4 sm:$0xff]  }
  0x74   :  { %939 = vmatpush1.bf16.msra.mxu0 %v1739_v23  ;;  %894 = vmatpush1.bf16.msra.mxu1 %v1850_v62  ;;  %v1784_v23 = vld [vmem:[#allocation5 + $0x294] ss:$8 sps:$4 sm:$0xff]   ;;  %v1917_v62 = vld [vmem:[#allocation7 + $0x60] ss:$8 sps:$4 sm:$0xff]  }
  0x75   :  { %940 = vmatprep.subr.bf16.mxu0 %v1740_v24  ;;  %895 = vmatprep.subr.bf16.mxu1 %v1854_v63  ;;  %v1886_v24 = vld [vmem:[#allocation5 + $0xe0] ss:$8 sps:$4 sm:$0xff]   ;;  %v1922_v63 = vld [vmem:[#allocation7 + $0x74] ss:$8 sps:$4 sm:$0xff]  }
  0x78   :  { %941 = vmatpush1.bf16.msra.mxu0 %v1742_v25  ;;  %896 = vmatpush1.bf16.msra.mxu1 %v1856_v2  ;;  %v1890_v25 = vld [vmem:[#allocation5 + $0xf4] ss:$8 sps:$4 sm:$0xff]   ;;  %v1920_v2 = vld [vmem:[#allocation7 + $0x70] ss:$8 sps:$4 sm:$0xff]  }
  0x79   :  { %942 = vmatprep.subr.bf16.mxu0 %v1743_v28  ;;  %897 = vmatprep.subr.bf16.mxu1 %v1860_v3  ;;  %v1892_v28 = vld [vmem:[#allocation5 + $0xf0] ss:$8 sps:$4 sm:$0xff]   ;;  %v1925_v3 = vld [vmem:[#allocation7 + $0x84] ss:$8 sps:$4 sm:$0xff]  }
  0x7c   :  { %943 = vmatpush1.bf16.msra.mxu0 %v1745_v31  ;;  %898 = vmatpush1.bf16.msra.mxu1 %v1862_v6  ;;  %v1785_v31 = vld [vmem:[#allocation5 + $0x2a0] ss:$8 sps:$4 sm:$0xff]  }
  0x7d   :  { %944 = vmatprep.subr.bf16.mxu0 %v1746_v32  ;;  %899 = vmatprep.subr.bf16.mxu1 %v1866_v7  ;;  %v1790_v32 = vld [vmem:[#allocation5 + $0x2b4] ss:$8 sps:$4 sm:$0xff]   ;;  %v1923_v6 = vld [vmem:[#allocation7 + $0x80] ss:$8 sps:$4 sm:$0xff]  }
  0x7e   :  { %v1928_v7 = vld [vmem:[#allocation7 + $0x94] ss:$8 sps:$4 sm:$0xff]  }
  0x80   :  { %945 = vmatpush1.bf16.msra.mxu0 %v1748_v35  ;;  %900 = vmatpush1.bf16.msra.mxu1 %v1868_v10  ;;  %v1899_v35 = vld [vmem:[#allocation7] ss:$8 sps:$4 sm:$0xff]   ;;  %v1926_v10 = vld [vmem:[#allocation7 + $0x90] ss:$8 sps:$4 sm:$0xff]  }
  0x81   :  { %946 = vmatprep.subr.bf16.mxu0 %v1749_v37  ;;  %901 = vmatprep.subr.bf16.mxu1 %v1872_v12  ;;  %v1793_v37 = vld [vmem:[#allocation5 + $0x2c4] ss:$8 sps:$4 sm:$0xff]   ;;  %v1833_v12 = vld [vmem:[#allocation5 + $0x340] ss:$8 sps:$4 sm:$0xff]  }
  0x84   :  { %947 = vmatpush1.bf16.msra.mxu0 %v1751_v40  ;;  %902 = vmatpush1.bf16.msra.mxu1 %v1874_v16  ;;  %v1791_v40 = vld [vmem:[#allocation5 + $0x2c0] ss:$8 sps:$4 sm:$0xff]   ;;  %v1839_v16 = vld [vmem:[#allocation5 + $0x350] ss:$8 sps:$4 sm:$0xff]  }
  0x85   :  { %948 = vmatprep.subr.bf16.mxu0 %v1752_v41  ;;  %903 = vmatprep.subr.bf16.mxu1 %v1878_v17  ;;  %v1796_v41 = vld [vmem:[#allocation5 + $0x2d4] ss:$8 sps:$4 sm:$0xff]   ;;  %v1847_v17 = vld [vmem:[#allocation5 + $0x364] ss:$8 sps:$4 sm:$0xff]  }
  0x88   :  { %949 = vmatpush1.bf16.msra.mxu0 %v1754_v43  ;;  %904 = vmatpush1.bf16.msra.mxu1 %v1880_v20  ;;  %v1910_v43 = vld [vmem:[#allocation7 + $0x34] ss:$8 sps:$4 sm:$0xff]   ;;  %v1845_v20 = vld [vmem:[#allocation5 + $0x360] ss:$8 sps:$4 sm:$0xff]  }
  0x89   :  { %959 = vmatprep.subr.bf16.mxu0 %v1757_v45  ;;  %905 = vmatprep.subr.bf16.mxu1 %v1884_v21  ;;  %v1799_v45 = vld [vmem:[#allocation5 + $0x2e4] ss:$8 sps:$4 sm:$0xff]   ;;  %v1853_v21 = vld [vmem:[#allocation5 + $0x374] ss:$8 sps:$4 sm:$0xff]  }
  0x8b   :  { %951 = vmatmul.mubr.bf16.vlgmr.msra.gmra.mrb[0].mxu0 %v220_v49  ;;  %v1805_v49 = vld [vmem:[#allocation5 + $0x2f4] ss:$8 sps:$4 sm:$0xff]  }
  0x8c   :  { %960 = vmatpush1.bf16.msra.mxu0 %v1755_v51  ;;  %991 = vmatprep.mubr.bf16.mxu0 %v223_v52  ;;  %v1916_v51 = vld [vmem:[#allocation7 + $0x54] ss:$8 sps:$4 sm:$0xff]   ;;  %v1803_v52 = vld [vmem:[#allocation5 + $0x2f0] ss:$8 sps:$4 sm:$0xff]  }
  0x8d   :  { %961 = vmatprep.subr.bf16.mxu0 %v1760_v53  ;;  %906 = vmatpush1.bf16.msra.mxu1 %v1886_v24  ;;  %v85_v53 = vld [vmem:[#allocation2 + $0x20] sm:$0xff] }
  0x8e   :  { %907 = vmatprep.subr.bf16.mxu1 %v1890_v25  ;;  %v1859_v24 = vld [vmem:[#allocation5 + $0x384] ss:$8 sps:$4 sm:$0xff]   ;;  %v1857_v25 = vld [vmem:[#allocation5 + $0x380] ss:$8 sps:$4 sm:$0xff]  }
  0x90   :  { %962 = vmatpush1.bf16.msra.mxu0 %v1758_v56  ;;  %v1914_v56 = vld [vmem:[#allocation7 + $0x50] ss:$8 sps:$4 sm:$0xff]  }
  0x91   :  { %963 = vmatprep.subr.bf16.mxu0 %v1763_v57  ;;  %908 = vmatpush1.bf16.msra.mxu1 %v1892_v28  ;;  %v222_v57 = vpack.c.bf16 %v85_v53, %v85_v53  ;;  %v1871_v28 = vld [vmem:[#allocation5 + $0x3a4] ss:$8 sps:$4 sm:$0xff]   ;;  %v227_v53 = vlaneseq }
  0x92   :  { %1249 = vmatprep.subr.bf16.mxu1 %v1901_v30  ;;  %v1877_v30 = vld [vmem:[#allocation5 + $0x3b4] ss:$8 sps:$4 sm:$0xff]  }
  0x94   :  { %964 = vmatpush1.bf16.msra.mxu0 %v1761_v60  ;;  %910 = vmatmul.mubr.bf16.vlgmr.msra.gmra.mrb[0].mxu1 %v218_v33  ;;  %v225_v60 = vpack.c.bf16 %v88_v55, %v88_v55  ;;  %v1881_v33 = vld [vmem:[#allocation5 + $0x3c0] ss:$8 sps:$4 sm:$0xff]  }
  0x95   :  { %965 = vmatprep.subr.bf16.mxu0 %v1766_v61  ;;  %1250 = vmatpush1.bf16.msra.mxu1 %v1899_v35  ;;  %v1817_v61 = vld [vmem:[#allocation5 + $0x314] ss:$8 sps:$4 sm:$0xff]   ;;  %v1887_v35 = vld [vmem:[#allocation5 + $0x3d0] ss:$8 sps:$4 sm:$0xff]  }
  0x96   :  { %1251 = vmatprep.subr.bf16.mxu1 %v1904_v36  ;;  %v1895_v36 = vld [vmem:[#allocation5 + $0x3e4] ss:$8 sps:$4 sm:$0xff]  }
  0x98   :  { %966 = vmatpush1.bf16.msra.mxu0 %v1764_v0  ;;  %v1815_v0 = vld [vmem:[#allocation5 + $0x310] ss:$8 sps:$4 sm:$0xff]  }
  0x99   :  { %967 = vmatprep.subr.bf16.mxu0 %v1769_v1  ;;  %1252 = vmatpush1.bf16.msra.mxu1 %v1902_v38  ;;  %v1823_v1 = vld [vmem:[#allocation5 + $0x324] ss:$8 sps:$4 sm:$0xff]   ;;  %v1898_v38 = vld [vmem:[#allocation5 + $0x3f4] ss:$8 sps:$4 sm:$0xff]  }
  0x9a   :  { %1253 = vmatprep.subr.bf16.mxu1 %v1907_v39  ;;  %v1896_v39 = vld [vmem:[#allocation5 + $0x3f0] ss:$8 sps:$4 sm:$0xff]  }
  0x9c   :  { %968 = vmatpush1.bf16.msra.mxu0 %v1767_v4  ;;  %v1821_v4 = vld [vmem:[#allocation5 + $0x320] ss:$8 sps:$4 sm:$0xff]  }
  0x9d   :  { %969 = vmatprep.subr.bf16.mxu0 %v1772_v5  ;;  %1254 = vmatpush1.bf16.msra.mxu1 %v1905_v42  ;;  %v1829_v5 = vld [vmem:[#allocation5 + $0x334] ss:$8 sps:$4 sm:$0xff]   ;;  %v1938_v42 = vld [vmem:[#allocation7 + $0xd0] ss:$8 sps:$4 sm:$0xff]  }
  0x9e   :  { %1255 = vmatprep.subr.bf16.mxu1 %v1910_v43  ;;  %v1940_v43 = vld [vmem:[#allocation7 + $0xd4] ss:$8 sps:$4 sm:$0xff]  }
  0xa0   :  { %970 = vmatpush1.bf16.msra.mxu0 %v1770_v8  ;;  %v1827_v8 = vld [vmem:[#allocation5 + $0x330] ss:$8 sps:$4 sm:$0xff]  }
  0xa1   :  { %971 = vmatprep.subr.bf16.mxu0 %v1775_v9  ;;  %1256 = vmatpush1.bf16.msra.mxu1 %v1908_v46  ;;  %v1835_v9 = vld [vmem:[#allocation5 + $0x344] ss:$8 sps:$4 sm:$0xff]   ;;  %v1946_v46 = vld [vmem:[#allocation7 + $0xf4] ss:$8 sps:$4 sm:$0xff]  }
  0xa2   :  { %1257 = vmatprep.subr.bf16.mxu1 %v1913_v47  ;;  %v1944_v47 = vld [vmem:[#allocation7 + $0xf0] ss:$8 sps:$4 sm:$0xff]  }
  0xa4   :  { %972 = vmatpush1.bf16.msra.mxu0 %v1773_v14  ;;  %v1929_v14 = vld [vmem:[#allocation7 + $0xa0] ss:$8 sps:$4 sm:$0xff]  }
  0xa5   :  { %973 = vmatprep.subr.bf16.mxu0 %v1778_v15  ;;  %1258 = vmatpush1.bf16.msra.mxu1 %v1911_v50  ;;  %v1934_v15 = vld [vmem:[#allocation7 + $0xb4] ss:$8 sps:$4 sm:$0xff]  }
  0xa6   :  { %1259 = vmatprep.subr.bf16.mxu1 %v1916_v51 }
  0xa8   :  { %974 = vmatpush1.bf16.msra.mxu0 %v1776_v18  ;;  %v1932_v18 = vld [vmem:[#allocation7 + $0xb0] ss:$8 sps:$4 sm:$0xff]  }
  0xa9   :  { %975 = vmatprep.subr.bf16.mxu0 %v1781_v19  ;;  %1260 = vmatpush1.bf16.msra.mxu1 %v1914_v56  ;;  %v1937_v19 = vld [vmem:[#allocation7 + $0xc4] ss:$8 sps:$4 sm:$0xff]   ;;  %v217_v56 = vld [vmem:[%s2207_s2] sm:$0x3] }
  0xaa   :  { %1261 = vmatprep.subr.bf16.mxu1 %v1919_v58 }
  0xac   :  { %976 = vmatpush1.bf16.msra.mxu0 %v1779_v22  ;;  %v1935_v22 = vld [vmem:[#allocation7 + $0xc0] ss:$8 sps:$4 sm:$0xff]  }
  0xad   :  { %977 = vmatprep.subr.bf16.mxu0 %v1784_v23  ;;  %1262 = vmatpush1.bf16.msra.mxu1 %v1917_v62  ;;  %v1851_v23 = vld [vmem:[#allocation5 + $0x370] ss:$8 sps:$4 sm:$0xff]  }
  0xae   :  { %1263 = vmatprep.subr.bf16.mxu1 %v1922_v63 }
  0xb0   :  { %978 = vmatpush1.bf16.msra.mxu0 %v1782_v26  ;;  %v1865_v26 = vld [vmem:[#allocation5 + $0x394] ss:$8 sps:$4 sm:$0xff]  }
  0xb1   :  { %979 = vmatprep.subr.bf16.mxu0 %v1787_v27  ;;  %1264 = vmatpush1.bf16.msra.mxu1 %v1920_v2  ;;  %v1863_v27 = vld [vmem:[#allocation5 + $0x390] ss:$8 sps:$4 sm:$0xff]  }
  0xb2   :  { %1265 = vmatprep.subr.bf16.mxu1 %v1925_v3 }
  0xb4   :  { %980 = vmatpush1.bf16.msra.mxu0 %v1785_v31  ;;  %v1875_v31 = vld [vmem:[#allocation5 + $0x3b0] ss:$8 sps:$4 sm:$0xff]  }
  0xb5   :  { %981 = vmatprep.subr.bf16.mxu0 %v1790_v32  ;;  %1266 = vmatpush1.bf16.msra.mxu1 %v1923_v6  ;;  %v1883_v32 = vld [vmem:[#allocation5 + $0x3c4] ss:$8 sps:$4 sm:$0xff]  }
  0xb6   :  { %1267 = vmatprep.subr.bf16.mxu1 %v1928_v7  ;;  %v1948_v7 = vld [vmem:[#allocation8] sm:$0xff]  }
  0xb8   :  { %982 = vmatpush1.bf16.msra.mxu0 %v1788_v34  ;;  %v1889_v34 = vld [vmem:[#allocation5 + $0x3d4] ss:$8 sps:$4 sm:$0xff]  }
  0xb9   :  { %983 = vmatprep.subr.bf16.mxu0 %v1793_v37  ;;  %1268 = vmatpush1.bf16.msra.mxu1 %v1926_v10  ;;  %v1893_v37 = vld [vmem:[#allocation5 + $0x3e0] ss:$8 sps:$4 sm:$0xff]  }
  0xba   :  { %1269 = vmatprep.subr.bf16.mxu1 %v1931_v11  ;;  %v1950_v10 = vld [vmem:[#allocation8 + $0x8] sm:$0xff]   ;;  %v1951_v11 = vld [vmem:[#allocation8 + $0x50] sm:$0xff]  }
  0xbc   :  { %984 = vmatpush1.bf16.msra.mxu0 %v1791_v40  ;;  %v87_v40 = vld [vmem:[#allocation2 + $0x30] sm:$0xff] }
  0xbd   :  { %985 = vmatprep.subr.bf16.mxu0 %v1796_v41  ;;  %1270 = vmatpush1.bf16.msra.mxu1 %v1929_v14  ;;  %v224_v41 = vpack.c.bf16 %v87_v40, %v87_v40  ;;  %v1954_v14 = vld [vmem:[#allocation8 + $0x18] sm:$0xff]  }
  0xbe   :  { %1271 = vmatprep.subr.bf16.mxu1 %v1934_v15  ;;  %v1955_v15 = vld [vmem:[#allocation8 + $0x60] sm:$0xff]  }
  0xc0   :  { %986 = vmatpush1.bf16.msra.mxu0 %v1794_v44  ;;  %v1943_v44 = vld [vmem:[#allocation7 + $0xe4] ss:$8 sps:$4 sm:$0xff]  }
  0xc1   :  { %987 = vmatprep.subr.bf16.mxu0 %v1799_v45  ;;  %1272 = vmatpush1.bf16.msra.mxu1 %v1932_v18  ;;  %v1941_v45 = vld [vmem:[#allocation7 + $0xe0] ss:$8 sps:$4 sm:$0xff]  }
  0xc2   :  { %1273 = vmatprep.subr.bf16.mxu1 %v1937_v19  ;;  %v1958_v18 = vld [vmem:[#allocation8 + $0x28] sm:$0xff]   ;;  %v1959_v19 = vld [vmem:[#allocation8 + $0x70] sm:$0xff]  }
  0xc4   :  { %988 = vmatpush1.bf16.msra.mxu0 %v1797_v48  ;;  %v1947_v48 = vld [vmem:[#allocation8 + $0x40] sm:$0xff]  }
  0xc5   :  { %989 = vmatprep.subr.bf16.mxu0 %v1805_v49  ;;  %1274 = vmatpush1.bf16.msra.mxu1 %v1935_v22  ;;  %v1962_v22 = vld [vmem:[#allocation8 + $0x38] sm:$0xff]  }
  0xc6   :  { %1275 = vmatprep.subr.bf16.mxu1 %v1940_v43 }
  0xc8   :  { %990 = vmatpush1.bf16.msra.mxu0 %v1803_v52 }
  0xc9   :  { %1000 = vmatprep.subr.bf16.mxu0 %v1811_v54  ;;  %1276 = vmatpush1.bf16.msra.mxu1 %v1938_v42  ;;  %v228_v54 = vshrl.u32 %v227_v53, 7 }
  0xca   :  { %1277 = vmatprep.subr.bf16.mxu1 %v1943_v44 }
  0xcb   :  { %992 = vmatmul.mubr.bf16.vlgmr.msra.gmra.mrb[0].mxu0 %v222_v57  ;;  %v229_v55 = vsub.s32 0, %v228_v54  ;;  %v233_v57 = vsub.s32 1, %v228_v54 }
  0xcc   :  { %1001 = vmatpush1.bf16.msra.mxu0 %v1809_v59  ;;  %1032 = vmatprep.mubr.bf16.mxu0 %v225_v60 }
  0xcd   :  { %1002 = vmatprep.subr.bf16.mxu0 %v1817_v61  ;;  %1278 = vmatpush1.bf16.msra.mxu1 %v1941_v45  ;;  %v230_v58 = vrot.slane %v217_v56, %v229_v55  ;;  %v234_v59 = vrot.slane %v217_v56, %v233_v57 }
  0xce   :  { %1279 = vmatprep.subr.bf16.mxu1 %v1946_v46 }
  0xd0   :  { %1003 = vmatpush1.bf16.msra.mxu0 %v1815_v0 }
  0xd1   :  { %1004 = vmatprep.subr.bf16.mxu0 %v1823_v1  ;;  %1280 = vmatpush1.bf16.msra.mxu1 %v1944_v47 }
  0xd2   :  { %1664 = vmatprep.subr.bf16.mxu1 %v1947_v48 }
  0xd4   :  { %1005 = vmatpush1.bf16.msra.mxu0 %v1821_v4 }
  0xd5   :  { %1006 = vmatprep.subr.bf16.mxu0 %v1829_v5 }
  0xd8   :  { %1007 = vmatpush1.bf16.msra.mxu0 %v1827_v8 }
  0xd9   :  { %1008 = vmatprep.subr.bf16.mxu0 %v1835_v9  ;;  %v1949_v9 = vld [vmem:[#allocation8 + $0x48] sm:$0xff]  }
  0xdc   :  { %1009 = vmatpush1.bf16.msra.mxu0 %v1833_v12  ;;  %v1952_v12 = vld [vmem:[#allocation8 + $0x10] sm:$0xff]  }
  0xdd   :  { %1010 = vmatprep.subr.bf16.mxu0 %v1841_v13  ;;  %v1953_v13 = vld [vmem:[#allocation8 + $0x58] sm:$0xff]  }
  0xe0   :  { %1011 = vmatpush1.bf16.msra.mxu0 %v1839_v16  ;;  %v1956_v16 = vld [vmem:[#allocation8 + $0x20] sm:$0xff]  }
  0xe1   :  { %1012 = vmatprep.subr.bf16.mxu0 %v1847_v17  ;;  %v1957_v17 = vld [vmem:[#allocation8 + $0x68] sm:$0xff]  }
  0xe4   :  { %1013 = vmatpush1.bf16.msra.mxu0 %v1845_v20  ;;  %v1960_v20 = vld [vmem:[#allocation8 + $0x30] sm:$0xff]  }
  0xe5   :  { %1014 = vmatprep.subr.bf16.mxu0 %v1853_v21  ;;  %v1961_v21 = vld [vmem:[#allocation8 + $0x78] sm:$0xff]  }
  0xe8   :  { %1015 = vmatpush1.bf16.msra.mxu0 %v1851_v23  ;;  %v1075_v23 = vld [vmem:[%s2209_s4] sm:$0x3]  ;;  %s2089_s4 = smov [#allocation10]  }
  0xe9   :  { %1016 = vmatprep.subr.bf16.mxu0 %v1859_v24  ;;  %v1082_v24 = vrot.slane %v1075_v23, %v229_v55  ;;  %s1476_s30 = sshll.u32 %s2089_s4, 4  ;;  %s1477_s30 = int_to_ptr.vmem [resolvable:$true] %s1476_s30 }
  0xea   :  { %s2051_s8 = scalar_lea.vmem %s1477_s30, 128  ;;  %p2056_p5 = scmp.lt.s32.totalorder %s1477_s30, %s1477_s30 }
  0xeb   :  { %p2052_p4 = scmp.ne.s32.totalorder %s1477_s30, %s2051_s8  ;;  %p2057_p6 = scmp.lt.s32.totalorder %s2051_s8, %s2051_s8 }
  0xec   :  { %1017 = vmatpush1.bf16.msra.mxu0 %v1857_v25  ;;  %v1086_v25 = vrot.slane %v1075_v23, %v233_v57 }
  0xed   :  { %1018 = vmatprep.subr.bf16.mxu0 %v1865_v26  ;;  %p2058_p7 = por %p2057_p6, %p2056_p5 }
  0xef   :  { %p2059_p8 = pnand %p2058_p7, %p2052_p4 }
  0xf0   :  { %1019 = vmatpush1.bf16.msra.mxu0 %v1863_v27 }
  0xf1   :  { %1020 = vmatprep.subr.bf16.mxu0 %v1871_v28 }
  0xf4   :  { %1021 = vmatpush1.bf16.msra.mxu0 %v1869_v29 }
  0xf5   :  { %1022 = vmatprep.subr.bf16.mxu0 %v1877_v30 }
  0xf8   :  { %1023 = vmatpush1.bf16.msra.mxu0 %v1875_v31 }
  0xf9   :  { %1024 = vmatprep.subr.bf16.mxu0 %v1883_v32 }
  0xfc   :  { %1025 = vmatpush1.bf16.msra.mxu0 %v1881_v33 }
  0xfd   :  { %1026 = vmatprep.subr.bf16.mxu0 %v1889_v34 }
 0x100   :  { %1027 = vmatpush1.bf16.msra.mxu0 %v1887_v35 }
 0x101   :  { %1028 = vmatprep.subr.bf16.mxu0 %v1895_v36 }
 0x104   :  { %1029 = vmatpush1.bf16.msra.mxu0 %v1893_v37  ;;  %v1647_v37 = vld [vmem:[%s2211_s6] ss:$0 sm:$0xff] }
 0x105   :  { %1030 = vmatprep.subr.bf16.mxu0 %v1898_v38 }
 0x108   :  { %1031 = vmatpush1.bf16.msra.mxu0 %v1896_v39 }
 0x10b   :  { %1033 = vmatmul.mubr.bf16.vlgmr.msra.gmra.mrb[0].mxu0 %v224_v41 }
 0x167   :  { %v911_v49 = vpop.f32.mrb[0].mxu1 }
 0x168   :  { %v913_v50 = vpop.f32.mrb[1].mxu1  ;;  %v912_v60 = vadd.f32 %v911_v49, %v230_v58 }
 0x169   :  { %v915_v51 = vpop.f32.mrb[2].mxu1  ;;  %v914_v61 = vadd.f32 %v913_v50, %v234_v59 }
 0x16a   :  { %v916_v52 = vpop.f32.mrb[3].mxu1 }
 0x1de   :  { %v1034_v62 = vpop.f32.mrb[0].mxu0 }
 0x1df   :  { %v1687_v63 = vadd.f32 %v1034_v62, %v912_v60  ;;  %v1036_v0 = vpop.f32.mrb[1].mxu0 }
 0x1e0   :  { %v1689_v1 = vadd.f32 %v1036_v0, %v914_v61  ;;  %v1038_v2 = vpop.f32.mrb[2].mxu0 }
 0x1e1   :  { %v1041_v3 = vmax.f32 %v1687_v63, 0.0  ;;  %v1039_v4 = vpop.f32.mrb[3].mxu0 }
 0x1e2   :  { %v1042_v5 = vmax.f32 %v1689_v1, 0.0 }
 0x1e3   :  { %v1076_v8 = vpack.c.bf16 %v1041_v3, %v1041_v3 }
 0x1e4   :  { %v1077_v6 = vpack.c.bf16 %v1042_v5, %v1042_v5 }
 0x1e6   :  { %1281 = vmatprep.mubr.bf16.mxu1 %v1077_v6 }
 0x1e7   :  { %1282 = vmatmul.mubr.bf16.vlgmr.msra.gmra.mrb[4].mxu1 %v1076_v8 }
 0x1e8   :  { %1665 = vmatpush3.bf16.msra.mxu1 %v1948_v7 }
 0x1e9   :  { %1666 = vmatprep.subr.bf16.mxu1 %v1949_v9 }
 0x1ec   :  { %1667 = vmatpush3.bf16.msra.mxu1 %v1950_v10 }
 0x1ed   :  { %1668 = vmatprep.subr.bf16.mxu1 %v1951_v11 }
 0x1f0   :  { %1669 = vmatpush3.bf16.msra.mxu1 %v1952_v12 }
 0x1f1   :  { %1670 = vmatprep.subr.bf16.mxu1 %v1953_v13 }
 0x1f4   :  { %1671 = vmatpush3.bf16.msra.mxu1 %v1954_v14 }
 0x1f5   :  { %1672 = vmatprep.subr.bf16.mxu1 %v1955_v15 }
 0x1f8   :  { %1673 = vmatpush3.bf16.msra.mxu1 %v1956_v16 }
 0x1f9   :  { %1674 = vmatprep.subr.bf16.mxu1 %v1957_v17 }
 0x1fc   :  { %1675 = vmatpush3.bf16.msra.mxu1 %v1958_v18 }
 0x1fd   :  { %1676 = vmatprep.subr.bf16.mxu1 %v1959_v19 }
 0x200   :  { %1677 = vmatpush3.bf16.msra.mxu1 %v1960_v20 }
 0x201   :  { %1678 = vmatprep.subr.bf16.mxu1 %v1961_v21 }
 0x204   :  { %1679 = vmatpush3.bf16.msra.mxu1 %v1962_v22 }
 0x2ba   :  { %v1283_v26 = vpop.f32.mrb[4].mxu1 }
 0x2bb   :  { %v1284_v27 = vadd.f32 %v1283_v26, %v1082_v24  ;;  %v1285_v28 = vpop.f32.mrb[5].mxu1 }
 0x2bc   :  { %v1286_v29 = vadd.f32 %v1285_v28, %v1086_v25  ;;  %v1287_v30 = vpop.f32.mrb[6].mxu1 }
 0x2bd   :  { %v1290_v31 = vmax.f32 %v1284_v27, 0.0  ;;  %v1288_v32 = vpop.f32.mrb[7].mxu1 }
 0x2be   :  { %v1291_v33 = vmax.f32 %v1286_v29, 0.0 }
 0x2bf   :  { %v1325_v35 = vpack.c.bf16 %v1290_v31, %v1290_v31 }
 0x2c0   :  { %v1326_v34 = vpack.c.bf16 %v1291_v33, %v1291_v33 }
 0x2c2   :  { %1461 = vmatprep.mubr.bf16.mxu1 %v1326_v34 }
 0x2c3   :  { %1462 = vmatmul.mubr.bf16.vlgmr.msra.gmra.mrb[8].mxu1 %v1325_v35 }
 0x396   :  { %v1680_v36 = vpop.f32.mrb[8].mxu1 }
 0x397   :  { %v1681_v38 = vpop.f32.mrb[9].mxu1 }
 0x398   :  { %v1682_v39 = vadd.f32 %v1681_v38, %v1680_v36  ;;  %v1683_v40 = vpop.f32.mrb[10].mxu1 }
 0x399   :  { %v1684_v41 = vpop.f32.mrb[11].mxu1 }
 0x39a   :  { %v1464_v42 = vadd.f32 %v1682_v39, %v1647_v37 }
 0x39c   :  { %1469 = vst [vmem:[#allocation10] sm:$0xff] %v1464_v42 }
 0x39d   :  { %2062 = shalt.err (!%p2059_p8)
}
 0x39e   :  { %s2063_s6 = scalar_lea.hbm %s2212_s7, 128 }
 0x39f   :  { %p2064_p9 = scmp.ne.s32.totalorder %s2212_s7, %s2063_s6  ;;  %p2067_p10 = scmp.lt.u32.totalorder %s2063_s6, %s2212_s7 }
 0x3a1   :  { %p2069_p11 = pnand %p2067_p10, %p2064_p9 }
 0x3a3   :  { %2072 = shalt.err (!%p2069_p11)
}
 0x3a4   :  { %1479 = dma.vmem_to_hbm [thread:$0]  %s1477_s30, 128, %s2212_s7, [#allocation4]  }
 0x3a5   :  { %2079 = dma.done.wait [#allocation4], 128  }
 0x3a6   :  { %2080 = vsyncadd [#allocation4], 4294967168 }
 0x3a7   :  { %1483 = vsyncpa [#allocation3], 1 }
 0x3a8   :  { %1484 = vsyncpa [#allocation6], 1 }
 0x3a9   :  { %1485 = vsyncpa [#allocation9], 1 }
 0x3aa   :  { %1486 = vsyncpa [#allocation4], 1 }

// kernel: tpu_custom_call.1
= control target key start
LH: loop header
LB: loop body
LE: loop exit
PB: predicated region body
PF: predicated region fallthrough
CT: control target
= control target key end

     0   :  { %12 = vsyncpa [#allocation3], 0  ;;  %s2205_s0 = inlined_call_operand.hbm [shape: f32[8,1024], index: 0, kind: input, shape index: {}]   ;;  %s2206_s1 = inlined_call_operand.hbm [shape: bf16[1024,256], index: 1, kind: input, shape index: {}]   ;;  %s2207_s2 = inlined_call_operand.vmem [shape: f32[1,256], index: 2, kind: input, shape index: {}]   ;;  %s2208_s3 = inlined_call_operand.hbm [shape: bf16[256,256], index: 3, kind: input, shape index: {}]   ;;  %s2209_s4 = inlined_call_operand.vmem [shape: f32[1,256], index: 4, kind: input, shape index: {}]   ;;  %s2210_s5 = inlined_call_operand.hbm [shape: bf16[256,128], index: 5, kind: input, shape index: {}]   ;;  %s2211_s6 = inlined_call_operand.vmem [shape: f32[1,128], index: 6, kind: input, shape index: {}]   ;;  %s2212_s7 = inlined_call_operand.hbm [shape: f32[8,128], index: 7, kind: output, shape index: {}]  }
   0x1   :  { %13 = vsyncpa [#allocation6], 0 }
   0x2   :  { %14 = vsyncpa [#allocation9], 0 }
   0x3   :  { %15 = vsyncpa [#allocation4], 0  ;;  %s2081_s24 = smov [#allocation5]   ;;  %s1963_s28 = scalar_lea.hbm %s2206_s1, 16384 }
   0x4   :  { %s31_s25 = sshll.u32 %s2081_s24, 4  ;;  %p1964_p0 = scmp.ne.s32.totalorder %s2206_s1, %s1963_s28  ;;  %s32_s25 = int_to_ptr.vmem [resolvable:$true] %s31_s25 }
   0x5   :  { %p1967_p1 = scmp.lt.u32.totalorder %s1963_s28, %s2206_s1 }
   0x7   :  { %p1969_p2 = pnand %p1967_p1, %p1964_p0 }
   0x9   :  { %1972 = shalt.err (!%p1969_p2)
}
   0xa   :  { %s1973_s10 = scalar_lea.vmem %s32_s25, 16384  ;;  %p1978_p4 = scmp.lt.s32.totalorder %s32_s25, %s32_s25 }
   0xb   :  { %p1974_p3 = scmp.ne.s32.totalorder %s32_s25, %s1973_s10  ;;  %p1979_p5 = scmp.lt.s32.totalorder %s1973_s10, %s1973_s10 }
   0xd   :  { %p1980_p6 = por %p1979_p5, %p1978_p4 }
   0xf   :  { %p1981_p7 = pnand %p1980_p6, %p1974_p3 }
  0x11   :  { %1984 = shalt.err (!%p1981_p7)
}
  0x12   :  { %s2082_s11 = smov 128   ;;  %s2083_s12 = smov 8  }
  0x13   :  { %37 = dma.hbm_to_vmem [thread:$0]  %s2206_s1, 16384, %s32_s25, [#allocation6], %s2082_s11, %s2082_s11, %s2083_s12  }
  0x14   :  { %s2084_s15 = smov [#allocation2]   ;;  %s2085_s17 = smov [#allocation7]  }
  0x15   :  { %s22_s16 = sshll.u32 %s2084_s15, 4  ;;  %s45_s18 = sshll.u32 %s2085_s17, 4  ;;  %s23_s16 = int_to_ptr.vmem [resolvable:$true] %s22_s16  ;;  %s46_s18 = int_to_ptr.vmem [resolvable:$true] %s45_s18 }
  0x16   :  { %s1985_s21 = scalar_lea.hbm %s2205_s0, 1024 }
  0x17   :  { %p1986_p8 = scmp.ne.s32.totalorder %s2205_s0, %s1985_s21  ;;  %p1989_p9 = scmp.lt.u32.totalorder %s1985_s21, %s2205_s0 }
  0x19   :  { %p1991_p10 = pnand %p1989_p9, %p1986_p8 }
  0x1b   :  { %1994 = shalt.err (!%p1991_p10)
}
  0x1c   :  { %s1995_s1 = scalar_lea.vmem %s23_s16, 1024  ;;  %p2000_p12 = scmp.lt.s32.totalorder %s23_s16, %s23_s16 }
  0x1d   :  { %p1996_p11 = scmp.ne.s32.totalorder %s23_s16, %s1995_s1  ;;  %p2001_p13 = scmp.lt.s32.totalorder %s1995_s1, %s1995_s1 }
  0x1f   :  { %p2002_p0 = por %p2001_p13, %p2000_p12 }
  0x21   :  { %p2003_p1 = pnand %p2002_p0, %p1996_p11 }
  0x23   :  { %2006 = shalt.err (!%p2003_p1)
}
  0x24   :  { %25 = dma.hbm_to_vmem [thread:$0]  %s2205_s0, 1024, %s23_s16, [#allocation3]  }
  0x25   :  { %s2007_s30 = scalar_lea.hbm %s2208_s3, 4096 }
  0x26   :  { %p2008_p2 = scmp.ne.s32.totalorder %s2208_s3, %s2007_s30  ;;  %p2011_p3 = scmp.lt.u32.totalorder %s2007_s30, %s2208_s3 }
  0x28   :  { %p2013_p4 = pnand %p2011_p3, %p2008_p2 }
  0x2a   :  { %2016 = shalt.err (!%p2013_p4)
}
  0x2b   :  { %s2017_s14 = scalar_lea.vmem %s46_s18, 4096  ;;  %p2022_p6 = scmp.lt.s32.totalorder %s46_s18, %s46_s18 }
  0x2c   :  { %p2018_p5 = scmp.ne.s32.totalorder %s46_s18, %s2017_s14  ;;  %p2023_p7 = scmp.lt.s32.totalorder %s2017_s14, %s2017_s14 }
  0x2e   :  { %p2024_p8 = por %p2023_p7, %p2022_p6 }
  0x30   :  { %p2025_p9 = pnand %p2024_p8, %p2018_p5 }
  0x32   :  { %2028 = shalt.err (!%p2025_p9)
}
  0x33   :  { %51 = dma.hbm_to_vmem [thread:$0]  %s2208_s3, 4096, %s46_s18, [#allocation6], %s2082_s11, %s2082_s11, %s2083_s12  }
  0x34   :  { %s2086_s16 = smov [#allocation8]   ;;  %s2029_s21 = scalar_lea.hbm %s2210_s5, 2048 }
  0x35   :  { %s59_s17 = sshll.u32 %s2086_s16, 4  ;;  %p2030_p10 = scmp.ne.s32.totalorder %s2210_s5, %s2029_s21  ;;  %s60_s17 = int_to_ptr.vmem [resolvable:$true] %s59_s17 }
  0x36   :  { %p2033_p11 = scmp.lt.u32.totalorder %s2029_s21, %s2210_s5 }
  0x38   :  { %p2035_p12 = pnand %p2033_p11, %p2030_p10 }
  0x3a   :  { %2038 = shalt.err (!%p2035_p12)
}
  0x3b   :  { %s2039_s1 = scalar_lea.vmem %s60_s17, 2048  ;;  %p2044_p0 = scmp.lt.s32.totalorder %s60_s17, %s60_s17 }
  0x3c   :  { %p2040_p13 = scmp.ne.s32.totalorder %s60_s17, %s2039_s1  ;;  %p2045_p1 = scmp.lt.s32.totalorder %s2039_s1, %s2039_s1 }
  0x3e   :  { %p2046_p2 = por %p2045_p1, %p2044_p0 }
  0x40   :  { %p2047_p3 = pnand %p2046_p2, %p2040_p13 }
  0x42   :  { %2050 = shalt.err (!%p2047_p3)
}
  0x43   :  { %s2087_s3 = smov 64   ;;  %s2088_s11 = smov 4  }
  0x44   :  { %65 = dma.hbm_to_vmem [thread:$0]  %s2210_s5, 2048, %s60_s17, [#allocation9], %s2087_s3, %s2087_s3, %s2088_s11  }
  0x45   :  { %2073 = dma.done.wait [#allocation3], 1024  }
  0x46   :  { %2074 = vsyncadd [#allocation3], 4294966272 }
  0x47   :  { %2075 = dma.done.wait [#allocation6], 20480  }
  0x48   :  { %2076 = vsyncadd [#allocation6], 4294946816 }
  0x49   :  { %2077 = dma.done.wait [#allocation9], 2048  }
  0x4a   :  { %2078 = vsyncadd [#allocation9], 4294965248  ;;  %v1707_v0 = vld [vmem:[#allocation5 + $0x104] ss:$8 sps:$4 sm:$0xff]   ;;  %v1709_v1 = vld [vmem:[#allocation5 + $0x100] ss:$8 sps:$4 sm:$0xff]  }
  0x4b   :  { %918 = vmatprep.subr.bf16.mxu0 %v1707_v0  ;;  %v1710_v2 = vld [vmem:[#allocation5 + $0x114] ss:$8 sps:$4 sm:$0xff]   ;;  %v1712_v3 = vld [vmem:[#allocation5 + $0x110] ss:$8 sps:$4 sm:$0xff]   ;;  %v1713_v4 = vld [vmem:[#allocation5 + $0x124] ss:$8 sps:$4 sm:$0xff]  }
  0x4c   :  { %919 = vmatpush1.bf16.msra.mxu0 %v1709_v1  ;;  %v1715_v5 = vld [vmem:[#allocation5 + $0x120] ss:$8 sps:$4 sm:$0xff]   ;;  %v1716_v6 = vld [vmem:[#allocation5 + $0x134] ss:$8 sps:$4 sm:$0xff]   ;;  %v1718_v7 = vld [vmem:[#allocation5 + $0x130] ss:$8 sps:$4 sm:$0xff]  }
  0x4d   :  { %920 = vmatprep.subr.bf16.mxu0 %v1710_v2  ;;  %v1719_v8 = vld [vmem:[#allocation5 + $0x144] ss:$8 sps:$4 sm:$0xff]   ;;  %v1721_v9 = vld [vmem:[#allocation5 + $0x140] ss:$8 sps:$4 sm:$0xff]   ;;  %v1722_v10 = vld [vmem:[#allocation5 + $0x154] ss:$8 sps:$4 sm:$0xff]  }
  0x4e   :  { %v1724_v11 = vld [vmem:[#allocation5 + $0x150] ss:$8 sps:$4 sm:$0xff]   ;;  %v1725_v12 = vld [vmem:[#allocation5 + $0x164] ss:$8 sps:$4 sm:$0xff]   ;;  %v1727_v15 = vld [vmem:[#allocation5 + $0x160] ss:$8 sps:$4 sm:$0xff]  }
  0x4f   :  { %v84_v13 = vld [vmem:[#allocation2 + $0x18] sm:$0xff]  ;;  %v1731_v18 = vld [vmem:[#allocation5 + $0x184] ss:$8 sps:$4 sm:$0xff]   ;;  %v1733_v19 = vld [vmem:[#allocation5 + $0x180] ss:$8 sps:$4 sm:$0xff]  }
  0x50   :  { %921 = vmatpush1.bf16.msra.mxu0 %v1712_v3  ;;  %v221_v14 = vpack.c.bf16 %v84_v13, %v84_v13  ;;  %v1728_v16 = vld [vmem:[#allocation5 + $0x174] ss:$8 sps:$4 sm:$0xff]   ;;  %v1730_v17 = vld [vmem:[#allocation5 + $0x170] ss:$8 sps:$4 sm:$0xff]   ;;  %v1737_v22 = vld [vmem:[#allocation5 + $0x1a4] ss:$8 sps:$4 sm:$0xff]  }
  0x51   :  { %922 = vmatprep.subr.bf16.mxu0 %v1713_v4  ;;  %v1734_v20 = vld [vmem:[#allocation5 + $0x194] ss:$8 sps:$4 sm:$0xff]   ;;  %v1736_v21 = vld [vmem:[#allocation5 + $0x190] ss:$8 sps:$4 sm:$0xff]   ;;  %v1739_v23 = vld [vmem:[#allocation5 + $0x1a0] ss:$8 sps:$4 sm:$0xff]  }
  0x52   :  { %950 = vmatprep.mubr.bf16.mxu0 %v221_v14  ;;  %v1740_v24 = vld [vmem:[#allocation5 + $0x1b4] ss:$8 sps:$4 sm:$0xff]   ;;  %v1742_v25 = vld [vmem:[#allocation5 + $0x1b0] ss:$8 sps:$4 sm:$0xff]   ;;  %v1800_v26 = vld [vmem:[#allocation5 + $0x4] ss:$8 sps:$4 sm:$0xff]  }
  0x53   :  { %v1802_v27 = vld [vmem:[#allocation5] ss:$8 sps:$4 sm:$0xff]   ;;  %v1743_v28 = vld [vmem:[#allocation5 + $0x1c4] ss:$8 sps:$4 sm:$0xff]   ;;  %877 = vmatprep.subr.bf16.mxu1 %v1800_v26  ;;  %v1806_v29 = vld [vmem:[#allocation5 + $0x14] ss:$8 sps:$4 sm:$0xff]  }
  0x54   :  { %923 = vmatpush1.bf16.msra.mxu0 %v1715_v5  ;;  %878 = vmatpush1.bf16.msra.mxu1 %v1802_v27  ;;  %v1808_v30 = vld [vmem:[#allocation5 + $0x10] ss:$8 sps:$4 sm:$0xff]   ;;  %v1745_v31 = vld [vmem:[#allocation5 + $0x1c0] ss:$8 sps:$4 sm:$0xff]   ;;  %v1746_v32 = vld [vmem:[#allocation5 + $0x1d4] ss:$8 sps:$4 sm:$0xff]  }
  0x55   :  { %924 = vmatprep.subr.bf16.mxu0 %v1716_v6  ;;  %879 = vmatprep.subr.bf16.mxu1 %v1806_v29  ;;  %v1812_v33 = vld [vmem:[#allocation5 + $0x24] ss:$8 sps:$4 sm:$0xff]   ;;  %v1814_v34 = vld [vmem:[#allocation5 + $0x20] ss:$8 sps:$4 sm:$0xff]   ;;  %v1748_v35 = vld [vmem:[#allocation5 + $0x1d0] ss:$8 sps:$4 sm:$0xff]  }
  0x56   :  { %v1818_v36 = vld [vmem:[#allocation5 + $0x34] ss:$8 sps:$4 sm:$0xff]   ;;  %v1749_v37 = vld [vmem:[#allocation5 + $0x1e4] ss:$8 sps:$4 sm:$0xff]   ;;  %v1820_v38 = vld [vmem:[#allocation5 + $0x30] ss:$8 sps:$4 sm:$0xff]  }
  0x57   :  { %v1824_v39 = vld [vmem:[#allocation5 + $0x44] ss:$8 sps:$4 sm:$0xff]   ;;  %v1751_v40 = vld [vmem:[#allocation5 + $0x1e0] ss:$8 sps:$4 sm:$0xff]   ;;  %v1752_v41 = vld [vmem:[#allocation5 + $0x1f4] ss:$8 sps:$4 sm:$0xff]  }
  0x58   :  { %925 = vmatpush1.bf16.msra.mxu0 %v1718_v7  ;;  %880 = vmatpush1.bf16.msra.mxu1 %v1808_v30  ;;  %v1826_v42 = vld [vmem:[#allocation5 + $0x40] ss:$8 sps:$4 sm:$0xff]   ;;  %v1754_v43 = vld [vmem:[#allocation5 + $0x1f0] ss:$8 sps:$4 sm:$0xff]   ;;  %v1830_v44 = vld [vmem:[#allocation5 + $0x54] ss:$8 sps:$4 sm:$0xff]  }
  0x59   :  { %926 = vmatprep.subr.bf16.mxu0 %v1719_v8  ;;  %881 = vmatprep.subr.bf16.mxu1 %v1812_v33  ;;  %v1757_v45 = vld [vmem:[#allocation5 + $0x204] ss:$8 sps:$4 sm:$0xff]   ;;  %v83_v46 = vld [vmem:[#allocation2 + $0x10] sm:$0xff]  ;;  %v1755_v51 = vld [vmem:[#allocation5 + $0x200] ss:$8 sps:$4 sm:$0xff]  }
  0x5a   :  { %v86_v47 = vld [vmem:[#allocation2 + $0x28] sm:$0xff]  ;;  %v1832_v48 = vld [vmem:[#allocation5 + $0x50] ss:$8 sps:$4 sm:$0xff]   ;;  %v220_v49 = vpack.c.bf16 %v83_v46, %v83_v46  ;;  %v1760_v53 = vld [vmem:[#allocation5 + $0x214] ss:$8 sps:$4 sm:$0xff]  }
  0x5b   :  { %v1836_v50 = vld [vmem:[#allocation5 + $0x64] ss:$8 sps:$4 sm:$0xff]   ;;  %v223_v52 = vpack.c.bf16 %v86_v47, %v86_v47  ;;  %v1838_v54 = vld [vmem:[#allocation5 + $0x60] ss:$8 sps:$4 sm:$0xff]   ;;  %v1842_v55 = vld [vmem:[#allocation5 + $0x74] ss:$8 sps:$4 sm:$0xff]  }
  0x5c   :  { %927 = vmatpush1.bf16.msra.mxu0 %v1721_v9  ;;  %882 = vmatpush1.bf16.msra.mxu1 %v1814_v34  ;;  %v1758_v56 = vld [vmem:[#allocation5 + $0x210] ss:$8 sps:$4 sm:$0xff]   ;;  %v1763_v57 = vld [vmem:[#allocation5 + $0x224] ss:$8 sps:$4 sm:$0xff]   ;;  %v1761_v60 = vld [vmem:[#allocation5 + $0x220] ss:$8 sps:$4 sm:$0xff]  }
  0x5d   :  { %928 = vmatprep.subr.bf16.mxu0 %v1722_v10  ;;  %883 = vmatprep.subr.bf16.mxu1 %v1818_v36  ;;  %v1844_v58 = vld [vmem:[#allocation5 + $0x70] ss:$8 sps:$4 sm:$0xff]   ;;  %v1848_v59 = vld [vmem:[#allocation5 + $0x84] ss:$8 sps:$4 sm:$0xff]   ;;  %v1766_v61 = vld [vmem:[#allocation5 + $0x234] ss:$8 sps:$4 sm:$0xff]  }
  0x5e   :  { %v1850_v62 = vld [vmem:[#allocation5 + $0x80] ss:$8 sps:$4 sm:$0xff]   ;;  %v1854_v63 = vld [vmem:[#allocation5 + $0x94] ss:$8 sps:$4 sm:$0xff]   ;;  %v1764_v0 = vld [vmem:[#allocation5 + $0x230] ss:$8 sps:$4 sm:$0xff]  }
  0x5f   :  { %v1769_v1 = vld [vmem:[#allocation5 + $0x244] ss:$8 sps:$4 sm:$0xff]   ;;  %v1856_v2 = vld [vmem:[#allocation5 + $0x90] ss:$8 sps:$4 sm:$0xff]   ;;  %v1767_v4 = vld [vmem:[#allocation5 + $0x240] ss:$8 sps:$4 sm:$0xff]  }
  0x60   :  { %929 = vmatpush1.bf16.msra.mxu0 %v1724_v11  ;;  %884 = vmatpush1.bf16.msra.mxu1 %v1820_v38  ;;  %v1860_v3 = vld [vmem:[#allocation5 + $0xa4] ss:$8 sps:$4 sm:$0xff]   ;;  %v1772_v5 = vld [vmem:[#allocation5 + $0x254] ss:$8 sps:$4 sm:$0xff]   ;;  %v1862_v6 = vld [vmem:[#allocation5 + $0xa0] ss:$8 sps:$4 sm:$0xff]  }
  0x61   :  { %930 = vmatprep.subr.bf16.mxu0 %v1725_v12  ;;  %885 = vmatprep.subr.bf16.mxu1 %v1824_v39  ;;  %v1866_v7 = vld [vmem:[#allocation5 + $0xb4] ss:$8 sps:$4 sm:$0xff]   ;;  %v1770_v8 = vld [vmem:[#allocation5 + $0x250] ss:$8 sps:$4 sm:$0xff]   ;;  %v1775_v9 = vld [vmem:[#allocation5 + $0x264] ss:$8 sps:$4 sm:$0xff]  }
  0x62   :  { %v1868_v10 = vld [vmem:[#allocation5 + $0xb0] ss:$8 sps:$4 sm:$0xff]   ;;  %v82_v11 = vld [vmem:[#allocation2 + $0x8] sm:$0xff]  ;;  %v81_v29 = vld [vmem:[#allocation2] sm:$0xff] }
  0x63   :  { %v1872_v12 = vld [vmem:[#allocation5 + $0xc4] ss:$8 sps:$4 sm:$0xff]   ;;  %v219_v13 = vpack.c.bf16 %v82_v11, %v82_v11  ;;  %v1773_v14 = vld [vmem:[#allocation5 + $0x260] ss:$8 sps:$4 sm:$0xff]   ;;  %v1782_v26 = vld [vmem:[#allocation5 + $0x290] ss:$8 sps:$4 sm:$0xff]   ;;  %v218_v33 = vpack.c.bf16 %v81_v29, %v81_v29 }
  0x64   :  { %931 = vmatpush1.bf16.msra.mxu0 %v1727_v15  ;;  %886 = vmatpush1.bf16.msra.mxu1 %v1826_v42  ;;  %v1778_v15 = vld [vmem:[#allocation5 + $0x274] ss:$8 sps:$4 sm:$0xff]   ;;  %v1787_v27 = vld [vmem:[#allocation5 + $0x2a4] ss:$8 sps:$4 sm:$0xff]   ;;  %v1788_v34 = vld [vmem:[#allocation5 + $0x2b0] ss:$8 sps:$4 sm:$0xff]  }
  0x65   :  { %932 = vmatprep.subr.bf16.mxu0 %v1728_v16  ;;  %887 = vmatprep.subr.bf16.mxu1 %v1830_v44  ;;  %v1874_v16 = vld [vmem:[#allocation5 + $0xc0] ss:$8 sps:$4 sm:$0xff]   ;;  %v1901_v30 = vld [vmem:[#allocation7 + $0x4] ss:$8 sps:$4 sm:$0xff]   ;;  %v1904_v36 = vld [vmem:[#allocation7 + $0x14] ss:$8 sps:$4 sm:$0xff]  }
  0x66   :  { %909 = vmatprep.mubr.bf16.mxu1 %v219_v13  ;;  %v1902_v38 = vld [vmem:[#allocation7 + $0x10] ss:$8 sps:$4 sm:$0xff]   ;;  %v1907_v39 = vld [vmem:[#allocation7 + $0x24] ss:$8 sps:$4 sm:$0xff]   ;;  %v1905_v42 = vld [vmem:[#allocation7 + $0x20] ss:$8 sps:$4 sm:$0xff]  }
  0x67   :  { %v1794_v44 = vld [vmem:[#allocation5 + $0x2d0] ss:$8 sps:$4 sm:$0xff]   ;;  %v1913_v47 = vld [vmem:[#allocation7 + $0x44] ss:$8 sps:$4 sm:$0xff]   ;;  %v1841_v13 = vld [vmem:[#allocation5 + $0x354] ss:$8 sps:$4 sm:$0xff]  }
  0x68   :  { %933 = vmatpush1.bf16.msra.mxu0 %v1730_v17  ;;  %888 = vmatpush1.bf16.msra.mxu1 %v1832_v48  ;;  %v1878_v17 = vld [vmem:[#allocation5 + $0xd4] ss:$8 sps:$4 sm:$0xff]   ;;  %v1908_v46 = vld [vmem:[#allocation7 + $0x30] ss:$8 sps:$4 sm:$0xff]   ;;  %v1797_v48 = vld [vmem:[#allocation5 + $0x2e0] ss:$8 sps:$4 sm:$0xff]  }
  0x69   :  { %934 = vmatprep.subr.bf16.mxu0 %v1731_v18  ;;  %889 = vmatprep.subr.bf16.mxu1 %v1836_v50  ;;  %v1776_v18 = vld [vmem:[#allocation5 + $0x270] ss:$8 sps:$4 sm:$0xff]   ;;  %v1911_v50 = vld [vmem:[#allocation7 + $0x40] ss:$8 sps:$4 sm:$0xff]   ;;  %v1931_v11 = vld [vmem:[#allocation7 + $0xa4] ss:$8 sps:$4 sm:$0xff]  }
  0x6a   :  { %v1869_v29 = vld [vmem:[#allocation5 + $0x3a0] ss:$8 sps:$4 sm:$0xff]  }
  0x6c   :  { %935 = vmatpush1.bf16.msra.mxu0 %v1733_v19  ;;  %890 = vmatpush1.bf16.msra.mxu1 %v1838_v54  ;;  %v1781_v19 = vld [vmem:[#allocation5 + $0x284] ss:$8 sps:$4 sm:$0xff]  }
  0x6d   :  { %936 = vmatprep.subr.bf16.mxu0 %v1734_v20  ;;  %891 = vmatprep.subr.bf16.mxu1 %v1842_v55  ;;  %v1880_v20 = vld [vmem:[#allocation5 + $0xd0] ss:$8 sps:$4 sm:$0xff]   ;;  %v1811_v54 = vld [vmem:[#allocation5 + $0x304] ss:$8 sps:$4 sm:$0xff]  }
  0x6e   :  { %v88_v55 = vld [vmem:[#allocation2 + $0x38] sm:$0xff] }
  0x70   :  { %937 = vmatpush1.bf16.msra.mxu0 %v1736_v21  ;;  %892 = vmatpush1.bf16.msra.mxu1 %v1844_v58  ;;  %v1884_v21 = vld [vmem:[#allocation5 + $0xe4] ss:$8 sps:$4 sm:$0xff]  }
  0x71   :  { %938 = vmatprep.subr.bf16.mxu0 %v1737_v22  ;;  %893 = vmatprep.subr.bf16.mxu1 %v1848_v59  ;;  %v1779_v22 = vld [vmem:[#allocation5 + $0x280] ss:$8 sps:$4 sm:$0xff]   ;;  %v1919_v58 = vld [vmem:[#allocation7 + $0x64] ss:$8 sps:$4 sm:$0xff]  }
  0x72   :  { %v1809_v59 = vld [vmem:[#allocation5 + $0x300] ss:$8 sps:$4 sm:$0xff]  }
  0x74   :  { %939 = vmatpush1.bf16.msra.mxu0 %v1739_v23  ;;  %894 = vmatpush1.bf16.msra.mxu1 %v1850_v62  ;;  %v1784_v23 = vld [vmem:[#allocation5 + $0x294] ss:$8 sps:$4 sm:$0xff]   ;;  %v1917_v62 = vld [vmem:[#allocation7 + $0x60] ss:$8 sps:$4 sm:$0xff]  }
  0x75   :  { %940 = vmatprep.subr.bf16.mxu0 %v1740_v24  ;;  %895 = vmatprep.subr.bf16.mxu1 %v1854_v63  ;;  %v1886_v24 = vld [vmem:[#allocation5 + $0xe0] ss:$8 sps:$4 sm:$0xff]   ;;  %v1922_v63 = vld [vmem:[#allocation7 + $0x74] ss:$8 sps:$4 sm:$0xff]  }
  0x78   :  { %941 = vmatpush1.bf16.msra.mxu0 %v1742_v25  ;;  %896 = vmatpush1.bf16.msra.mxu1 %v1856_v2  ;;  %v1890_v25 = vld [vmem:[#allocation5 + $0xf4] ss:$8 sps:$4 sm:$0xff]   ;;  %v1920_v2 = vld [vmem:[#allocation7 + $0x70] ss:$8 sps:$4 sm:$0xff]  }
  0x79   :  { %942 = vmatprep.subr.bf16.mxu0 %v1743_v28  ;;  %897 = vmatprep.subr.bf16.mxu1 %v1860_v3  ;;  %v1892_v28 = vld [vmem:[#allocation5 + $0xf0] ss:$8 sps:$4 sm:$0xff]   ;;  %v1925_v3 = vld [vmem:[#allocation7 + $0x84] ss:$8 sps:$4 sm:$0xff]  }
  0x7c   :  { %943 = vmatpush1.bf16.msra.mxu0 %v1745_v31  ;;  %898 = vmatpush1.bf16.msra.mxu1 %v1862_v6  ;;  %v1785_v31 = vld [vmem:[#allocation5 + $0x2a0] ss:$8 sps:$4 sm:$0xff]  }
  0x7d   :  { %944 = vmatprep.subr.bf16.mxu0 %v1746_v32  ;;  %899 = vmatprep.subr.bf16.mxu1 %v1866_v7  ;;  %v1790_v32 = vld [vmem:[#allocation5 + $0x2b4] ss:$8 sps:$4 sm:$0xff]   ;;  %v1923_v6 = vld [vmem:[#allocation7 + $0x80] ss:$8 sps:$4 sm:$0xff]  }
  0x7e   :  { %v1928_v7 = vld [vmem:[#allocation7 + $0x94] ss:$8 sps:$4 sm:$0xff]  }
  0x80   :  { %945 = vmatpush1.bf16.msra.mxu0 %v1748_v35  ;;  %900 = vmatpush1.bf16.msra.mxu1 %v1868_v10  ;;  %v1899_v35 = vld [vmem:[#allocation7] ss:$8 sps:$4 sm:$0xff]   ;;  %v1926_v10 = vld [vmem:[#allocation7 + $0x90] ss:$8 sps:$4 sm:$0xff]  }
  0x81   :  { %946 = vmatprep.subr.bf16.mxu0 %v1749_v37  ;;  %901 = vmatprep.subr.bf16.mxu1 %v1872_v12  ;;  %v1793_v37 = vld [vmem:[#allocation5 + $0x2c4] ss:$8 sps:$4 sm:$0xff]   ;;  %v1833_v12 = vld [vmem:[#allocation5 + $0x340] ss:$8 sps:$4 sm:$0xff]  }
  0x84   :  { %947 = vmatpush1.bf16.msra.mxu0 %v1751_v40  ;;  %902 = vmatpush1.bf16.msra.mxu1 %v1874_v16  ;;  %v1791_v40 = vld [vmem:[#allocation5 + $0x2c0] ss:$8 sps:$4 sm:$0xff]   ;;  %v1839_v16 = vld [vmem:[#allocation5 + $0x350] ss:$8 sps:$4 sm:$0xff]  }
  0x85   :  { %948 = vmatprep.subr.bf16.mxu0 %v1752_v41  ;;  %903 = vmatprep.subr.bf16.mxu1 %v1878_v17  ;;  %v1796_v41 = vld [vmem:[#allocation5 + $0x2d4] ss:$8 sps:$4 sm:$0xff]   ;;  %v1847_v17 = vld [vmem:[#allocation5 + $0x364] ss:$8 sps:$4 sm:$0xff]  }
  0x88   :  { %949 = vmatpush1.bf16.msra.mxu0 %v1754_v43  ;;  %904 = vmatpush1.bf16.msra.mxu1 %v1880_v20  ;;  %v1910_v43 = vld [vmem:[#allocation7 + $0x34] ss:$8 sps:$4 sm:$0xff]   ;;  %v1845_v20 = vld [vmem:[#allocation5 + $0x360] ss:$8 sps:$4 sm:$0xff]  }
  0x89   :  { %959 = vmatprep.subr.bf16.mxu0 %v1757_v45  ;;  %905 = vmatprep.subr.bf16.mxu1 %v1884_v21  ;;  %v1799_v45 = vld [vmem:[#allocation5 + $0x2e4] ss:$8 sps:$4 sm:$0xff]   ;;  %v1853_v21 = vld [vmem:[#allocation5 + $0x374] ss:$8 sps:$4 sm:$0xff]  }
  0x8b   :  { %951 = vmatmul.mubr.bf16.vlgmr.msra.gmra.mrb[0].mxu0 %v220_v49  ;;  %v1805_v49 = vld [vmem:[#allocation5 + $0x2f4] ss:$8 sps:$4 sm:$0xff]  }
  0x8c   :  { %960 = vmatpush1.bf16.msra.mxu0 %v1755_v51  ;;  %991 = vmatprep.mubr.bf16.mxu0 %v223_v52  ;;  %v1916_v51 = vld [vmem:[#allocation7 + $0x54] ss:$8 sps:$4 sm:$0xff]   ;;  %v1803_v52 = vld [vmem:[#allocation5 + $0x2f0] ss:$8 sps:$4 sm:$0xff]  }
  0x8d   :  { %961 = vmatprep.subr.bf16.mxu0 %v1760_v53  ;;  %906 = vmatpush1.bf16.msra.mxu1 %v1886_v24  ;;  %v85_v53 = vld [vmem:[#allocation2 + $0x20] sm:$0xff] }
  0x8e   :  { %907 = vmatprep.subr.bf16.mxu1 %v1890_v25  ;;  %v1859_v24 = vld [vmem:[#allocation5 + $0x384] ss:$8 sps:$4 sm:$0xff]   ;;  %v1857_v25 = vld [vmem:[#allocation5 + $0x380] ss:$8 sps:$4 sm:$0xff]  }
  0x90   :  { %962 = vmatpush1.bf16.msra.mxu0 %v1758_v56  ;;  %v1914_v56 = vld [vmem:[#allocation7 + $0x50] ss:$8 sps:$4 sm:$0xff]  }
  0x91   :  { %963 = vmatprep.subr.bf16.mxu0 %v1763_v57  ;;  %908 = vmatpush1.bf16.msra.mxu1 %v1892_v28  ;;  %v222_v57 = vpack.c.bf16 %v85_v53, %v85_v53  ;;  %v1871_v28 = vld [vmem:[#allocation5 + $0x3a4] ss:$8 sps:$4 sm:$0xff]   ;;  %v227_v53 = vlaneseq }
  0x92   :  { %1249 = vmatprep.subr.bf16.mxu1 %v1901_v30  ;;  %v1877_v30 = vld [vmem:[#allocation5 + $0x3b4] ss:$8 sps:$4 sm:$0xff]  }
  0x94   :  { %964 = vmatpush1.bf16.msra.mxu0 %v1761_v60  ;;  %910 = vmatmul.mubr.bf16.vlgmr.msra.gmra.mrb[0].mxu1 %v218_v33  ;;  %v225_v60 = vpack.c.bf16 %v88_v55, %v88_v55  ;;  %v1881_v33 = vld [vmem:[#allocation5 + $0x3c0] ss:$8 sps:$4 sm:$0xff]  }
  0x95   :  { %965 = vmatprep.subr.bf16.mxu0 %v1766_v61  ;;  %1250 = vmatpush1.bf16.msra.mxu1 %v1899_v35  ;;  %v1817_v61 = vld [vmem:[#allocation5 + $0x314] ss:$8 sps:$4 sm:$0xff]   ;;  %v1887_v35 = vld [vmem:[#allocation5 + $0x3d0] ss:$8 sps:$4 sm:$0xff]  }
  0x96   :  { %1251 = vmatprep.subr.bf16.mxu1 %v1904_v36  ;;  %v1895_v36 = vld [vmem:[#allocation5 + $0x3e4] ss:$8 sps:$4 sm:$0xff]  }
  0x98   :  { %966 = vmatpush1.bf16.msra.mxu0 %v1764_v0  ;;  %v1815_v0 = vld [vmem:[#allocation5 + $0x310] ss:$8 sps:$4 sm:$0xff]  }
  0x99   :  { %967 = vmatprep.subr.bf16.mxu0 %v1769_v1  ;;  %1252 = vmatpush1.bf16.msra.mxu1 %v1902_v38  ;;  %v1823_v1 = vld [vmem:[#allocation5 + $0x324] ss:$8 sps:$4 sm:$0xff]   ;;  %v1898_v38 = vld [vmem:[#allocation5 + $0x3f4] ss:$8 sps:$4 sm:$0xff]  }
  0x9a   :  { %1253 = vmatprep.subr.bf16.mxu1 %v1907_v39  ;;  %v1896_v39 = vld [vmem:[#allocation5 + $0x3f0] ss:$8 sps:$4 sm:$0xff]  }
  0x9c   :  { %968 = vmatpush1.bf16.msra.mxu0 %v1767_v4  ;;  %v1821_v4 = vld [vmem:[#allocation5 + $0x320] ss:$8 sps:$4 sm:$0xff]  }
  0x9d   :  { %969 = vmatprep.subr.bf16.mxu0 %v1772_v5  ;;  %1254 = vmatpush1.bf16.msra.mxu1 %v1905_v42  ;;  %v1829_v5 = vld [vmem:[#allocation5 + $0x334] ss:$8 sps:$4 sm:$0xff]   ;;  %v1938_v42 = vld [vmem:[#allocation7 + $0xd0] ss:$8 sps:$4 sm:$0xff]  }
  0x9e   :  { %1255 = vmatprep.subr.bf16.mxu1 %v1910_v43  ;;  %v1940_v43 = vld [vmem:[#allocation7 + $0xd4] ss:$8 sps:$4 sm:$0xff]  }
  0xa0   :  { %970 = vmatpush1.bf16.msra.mxu0 %v1770_v8  ;;  %v1827_v8 = vld [vmem:[#allocation5 + $0x330] ss:$8 sps:$4 sm:$0xff]  }
  0xa1   :  { %971 = vmatprep.subr.bf16.mxu0 %v1775_v9  ;;  %1256 = vmatpush1.bf16.msra.mxu1 %v1908_v46  ;;  %v1835_v9 = vld [vmem:[#allocation5 + $0x344] ss:$8 sps:$4 sm:$0xff]   ;;  %v1946_v46 = vld [vmem:[#allocation7 + $0xf4] ss:$8 sps:$4 sm:$0xff]  }
  0xa2   :  { %1257 = vmatprep.subr.bf16.mxu1 %v1913_v47  ;;  %v1944_v47 = vld [vmem:[#allocation7 + $0xf0] ss:$8 sps:$4 sm:$0xff]  }
  0xa4   :  { %972 = vmatpush1.bf16.msra.mxu0 %v1773_v14  ;;  %v1929_v14 = vld [vmem:[#allocation7 + $0xa0] ss:$8 sps:$4 sm:$0xff]  }
  0xa5   :  { %973 = vmatprep.subr.bf16.mxu0 %v1778_v15  ;;  %1258 = vmatpush1.bf16.msra.mxu1 %v1911_v50  ;;  %v1934_v15 = vld [vmem:[#allocation7 + $0xb4] ss:$8 sps:$4 sm:$0xff]  }
  0xa6   :  { %1259 = vmatprep.subr.bf16.mxu1 %v1916_v51 }
  0xa8   :  { %974 = vmatpush1.bf16.msra.mxu0 %v1776_v18  ;;  %v1932_v18 = vld [vmem:[#allocation7 + $0xb0] ss:$8 sps:$4 sm:$0xff]  }
  0xa9   :  { %975 = vmatprep.subr.bf16.mxu0 %v1781_v19  ;;  %1260 = vmatpush1.bf16.msra.mxu1 %v1914_v56  ;;  %v1937_v19 = vld [vmem:[#allocation7 + $0xc4] ss:$8 sps:$4 sm:$0xff]   ;;  %v217_v56 = vld [vmem:[%s2207_s2] sm:$0x3] }
  0xaa   :  { %1261 = vmatprep.subr.bf16.mxu1 %v1919_v58 }
  0xac   :  { %976 = vmatpush1.bf16.msra.mxu0 %v1779_v22  ;;  %v1935_v22 = vld [vmem:[#allocation7 + $0xc0] ss:$8 sps:$4 sm:$0xff]  }
  0xad   :  { %977 = vmatprep.subr.bf16.mxu0 %v1784_v23  ;;  %1262 = vmatpush1.bf16.msra.mxu1 %v1917_v62  ;;  %v1851_v23 = vld [vmem:[#allocation5 + $0x370] ss:$8 sps:$4 sm:$0xff]  }
  0xae   :  { %1263 = vmatprep.subr.bf16.mxu1 %v1922_v63 }
  0xb0   :  { %978 = vmatpush1.bf16.msra.mxu0 %v1782_v26  ;;  %v1865_v26 = vld [vmem:[#allocation5 + $0x394] ss:$8 sps:$4 sm:$0xff]  }
  0xb1   :  { %979 = vmatprep.subr.bf16.mxu0 %v1787_v27  ;;  %1264 = vmatpush1.bf16.msra.mxu1 %v1920_v2  ;;  %v1863_v27 = vld [vmem:[#allocation5 + $0x390] ss:$8 sps:$4 sm:$0xff]  }
  0xb2   :  { %1265 = vmatprep.subr.bf16.mxu1 %v1925_v3 }
  0xb4   :  { %980 = vmatpush1.bf16.msra.mxu0 %v1785_v31  ;;  %v1875_v31 = vld [vmem:[#allocation5 + $0x3b0] ss:$8 sps:$4 sm:$0xff]  }
  0xb5   :  { %981 = vmatprep.subr.bf16.mxu0 %v1790_v32  ;;  %1266 = vmatpush1.bf16.msra.mxu1 %v1923_v6  ;;  %v1883_v32 = vld [vmem:[#allocation5 + $0x3c4] ss:$8 sps:$4 sm:$0xff]  }
  0xb6   :  { %1267 = vmatprep.subr.bf16.mxu1 %v1928_v7  ;;  %v1948_v7 = vld [vmem:[#allocation8] sm:$0xff]  }
  0xb8   :  { %982 = vmatpush1.bf16.msra.mxu0 %v1788_v34  ;;  %v1889_v34 = vld [vmem:[#allocation5 + $0x3d4] ss:$8 sps:$4 sm:$0xff]  }
  0xb9   :  { %983 = vmatprep.subr.bf16.mxu0 %v1793_v37  ;;  %1268 = vmatpush1.bf16.msra.mxu1 %v1926_v10  ;;  %v1893_v37 = vld [vmem:[#allocation5 + $0x3e0] ss:$8 sps:$4 sm:$0xff]  }
  0xba   :  { %1269 = vmatprep.subr.bf16.mxu1 %v1931_v11  ;;  %v1950_v10 = vld [vmem:[#allocation8 + $0x8] sm:$0xff]   ;;  %v1951_v11 = vld [vmem:[#allocation8 + $0x50] sm:$0xff]  }
  0xbc   :  { %984 = vmatpush1.bf16.msra.mxu0 %v1791_v40  ;;  %v87_v40 = vld [vmem:[#allocation2 + $0x30] sm:$0xff] }
  0xbd   :  { %985 = vmatprep.subr.bf16.mxu0 %v1796_v41  ;;  %1270 = vmatpush1.bf16.msra.mxu1 %v1929_v14  ;;  %v224_v41 = vpack.c.bf16 %v87_v40, %v87_v40  ;;  %v1954_v14 = vld [vmem:[#allocation8 + $0x18] sm:$0xff]  }
  0xbe   :  { %1271 = vmatprep.subr.bf16.mxu1 %v1934_v15  ;;  %v1955_v15 = vld [vmem:[#allocation8 + $0x60] sm:$0xff]  }
  0xc0   :  { %986 = vmatpush1.bf16.msra.mxu0 %v1794_v44  ;;  %v1943_v44 = vld [vmem:[#allocation7 + $0xe4] ss:$8 sps:$4 sm:$0xff]  }
  0xc1   :  { %987 = vmatprep.subr.bf16.mxu0 %v1799_v45  ;;  %1272 = vmatpush1.bf16.msra.mxu1 %v1932_v18  ;;  %v1941_v45 = vld [vmem:[#allocation7 + $0xe0] ss:$8 sps:$4 sm:$0xff]  }
  0xc2   :  { %1273 = vmatprep.subr.bf16.mxu1 %v1937_v19  ;;  %v1958_v18 = vld [vmem:[#allocation8 + $0x28] sm:$0xff]   ;;  %v1959_v19 = vld [vmem:[#allocation8 + $0x70] sm:$0xff]  }
  0xc4   :  { %988 = vmatpush1.bf16.msra.mxu0 %v1797_v48  ;;  %v1947_v48 = vld [vmem:[#allocation8 + $0x40] sm:$0xff]  }
  0xc5   :  { %989 = vmatprep.subr.bf16.mxu0 %v1805_v49  ;;  %1274 = vmatpush1.bf16.msra.mxu1 %v1935_v22  ;;  %v1962_v22 = vld [vmem:[#allocation8 + $0x38] sm:$0xff]  }
  0xc6   :  { %1275 = vmatprep.subr.bf16.mxu1 %v1940_v43 }
  0xc8   :  { %990 = vmatpush1.bf16.msra.mxu0 %v1803_v52 }
  0xc9   :  { %1000 = vmatprep.subr.bf16.mxu0 %v1811_v54  ;;  %1276 = vmatpush1.bf16.msra.mxu1 %v1938_v42  ;;  %v228_v54 = vshrl.u32 %v227_v53, 7 }
  0xca   :  { %1277 = vmatprep.subr.bf16.mxu1 %v1943_v44 }
  0xcb   :  { %992 = vmatmul.mubr.bf16.vlgmr.msra.gmra.mrb[0].mxu0 %v222_v57  ;;  %v229_v55 = vsub.s32 0, %v228_v54  ;;  %v233_v57 = vsub.s32 1, %v228_v54 }
  0xcc   :  { %1001 = vmatpush1.bf16.msra.mxu0 %v1809_v59  ;;  %1032 = vmatprep.mubr.bf16.mxu0 %v225_v60 }
  0xcd   :  { %1002 = vmatprep.subr.bf16.mxu0 %v1817_v61  ;;  %1278 = vmatpush1.bf16.msra.mxu1 %v1941_v45  ;;  %v230_v58 = vrot.slane %v217_v56, %v229_v55  ;;  %v234_v59 = vrot.slane %v217_v56, %v233_v57 }
  0xce   :  { %1279 = vmatprep.subr.bf16.mxu1 %v1946_v46 }
  0xd0   :  { %1003 = vmatpush1.bf16.msra.mxu0 %v1815_v0 }
  0xd1   :  { %1004 = vmatprep.subr.bf16.mxu0 %v1823_v1  ;;  %1280 = vmatpush1.bf16.msra.mxu1 %v1944_v47 }
  0xd2   :  { %1664 = vmatprep.subr.bf16.mxu1 %v1947_v48 }
  0xd4   :  { %1005 = vmatpush1.bf16.msra.mxu0 %v1821_v4 }
  0xd5   :  { %1006 = vmatprep.subr.bf16.mxu0 %v1829_v5 }
  0xd8   :  { %1007 = vmatpush1.bf16.msra.mxu0 %v1827_v8 }
  0xd9   :  { %1008 = vmatprep.subr.bf16.mxu0 %v1835_v9  ;;  %v1949_v9 = vld [vmem:[#allocation8 + $0x48] sm:$0xff]  }
  0xdc   :  { %1009 = vmatpush1.bf16.msra.mxu0 %v1833_v12  ;;  %v1952_v12 = vld [vmem:[#allocation8 + $0x10] sm:$0xff]  }
  0xdd   :  { %1010 = vmatprep.subr.bf16.mxu0 %v1841_v13  ;;  %v1953_v13 = vld [vmem:[#allocation8 + $0x58] sm:$0xff]  }
  0xe0   :  { %1011 = vmatpush1.bf16.msra.mxu0 %v1839_v16  ;;  %v1956_v16 = vld [vmem:[#allocation8 + $0x20] sm:$0xff]  }
  0xe1   :  { %1012 = vmatprep.subr.bf16.mxu0 %v1847_v17  ;;  %v1957_v17 = vld [vmem:[#allocation8 + $0x68] sm:$0xff]  }
  0xe4   :  { %1013 = vmatpush1.bf16.msra.mxu0 %v1845_v20  ;;  %v1960_v20 = vld [vmem:[#allocation8 + $0x30] sm:$0xff]  }
  0xe5   :  { %1014 = vmatprep.subr.bf16.mxu0 %v1853_v21  ;;  %v1961_v21 = vld [vmem:[#allocation8 + $0x78] sm:$0xff]  }
  0xe8   :  { %1015 = vmatpush1.bf16.msra.mxu0 %v1851_v23  ;;  %v1075_v23 = vld [vmem:[%s2209_s4] sm:$0x3]  ;;  %s2089_s4 = smov [#allocation10]  }
  0xe9   :  { %1016 = vmatprep.subr.bf16.mxu0 %v1859_v24  ;;  %v1082_v24 = vrot.slane %v1075_v23, %v229_v55  ;;  %s1476_s30 = sshll.u32 %s2089_s4, 4  ;;  %s1477_s30 = int_to_ptr.vmem [resolvable:$true] %s1476_s30 }
  0xea   :  { %s2051_s8 = scalar_lea.vmem %s1477_s30, 128  ;;  %p2056_p5 = scmp.lt.s32.totalorder %s1477_s30, %s1477_s30 }
  0xeb   :  { %p2052_p4 = scmp.ne.s32.totalorder %s1477_s30, %s2051_s8  ;;  %p2057_p6 = scmp.lt.s32.totalorder %s2051_s8, %s2051_s8 }
  0xec   :  { %1017 = vmatpush1.bf16.msra.mxu0 %v1857_v25  ;;  %v1086_v25 = vrot.slane %v1075_v23, %v233_v57 }
  0xed   :  { %1018 = vmatprep.subr.bf16.mxu0 %v1865_v26  ;;  %p2058_p7 = por %p2057_p6, %p2056_p5 }
  0xef   :  { %p2059_p8 = pnand %p2058_p7, %p2052_p4 }
  0xf0   :  { %1019 = vmatpush1.bf16.msra.mxu0 %v1863_v27 }
  0xf1   :  { %1020 = vmatprep.subr.bf16.mxu0 %v1871_v28 }
  0xf4   :  { %1021 = vmatpush1.bf16.msra.mxu0 %v1869_v29 }
  0xf5   :  { %1022 = vmatprep.subr.bf16.mxu0 %v1877_v30 }
  0xf8   :  { %1023 = vmatpush1.bf16.msra.mxu0 %v1875_v31 }
  0xf9   :  { %1024 = vmatprep.subr.bf16.mxu0 %v1883_v32 }
  0xfc   :  { %1025 = vmatpush1.bf16.msra.mxu0 %v1881_v33 }
  0xfd   :  { %1026 = vmatprep.subr.bf16.mxu0 %v1889_v34 }
 0x100   :  { %1027 = vmatpush1.bf16.msra.mxu0 %v1887_v35 }
 0x101   :  { %1028 = vmatprep.subr.bf16.mxu0 %v1895_v36 }
 0x104   :  { %1029 = vmatpush1.bf16.msra.mxu0 %v1893_v37  ;;  %v1647_v37 = vld [vmem:[%s2211_s6] ss:$0 sm:$0xff] }
 0x105   :  { %1030 = vmatprep.subr.bf16.mxu0 %v1898_v38 }
 0x108   :  { %1031 = vmatpush1.bf16.msra.mxu0 %v1896_v39 }
 0x10b   :  { %1033 = vmatmul.mubr.bf16.vlgmr.msra.gmra.mrb[0].mxu0 %v224_v41 }
 0x167   :  { %v911_v49 = vpop.f32.mrb[0].mxu1 }
 0x168   :  { %v913_v50 = vpop.f32.mrb[1].mxu1  ;;  %v912_v60 = vadd.f32 %v911_v49, %v230_v58 }
 0x169   :  { %v915_v51 = vpop.f32.mrb[2].mxu1  ;;  %v914_v61 = vadd.f32 %v913_v50, %v234_v59 }
 0x16a   :  { %v916_v52 = vpop.f32.mrb[3].mxu1 }
 0x1de   :  { %v1034_v62 = vpop.f32.mrb[0].mxu0 }
 0x1df   :  { %v1687_v63 = vadd.f32 %v1034_v62, %v912_v60  ;;  %v1036_v0 = vpop.f32.mrb[1].mxu0 }
 0x1e0   :  { %v1689_v1 = vadd.f32 %v1036_v0, %v914_v61  ;;  %v1038_v2 = vpop.f32.mrb[2].mxu0 }
 0x1e1   :  { %v1041_v3 = vmax.f32 %v1687_v63, 0.0  ;;  %v1039_v4 = vpop.f32.mrb[3].mxu0 }
 0x1e2   :  { %v1042_v5 = vmax.f32 %v1689_v1, 0.0 }
 0x1e3   :  { %v1076_v8 = vpack.c.bf16 %v1041_v3, %v1041_v3 }
 0x1e4   :  { %v1077_v6 = vpack.c.bf16 %v1042_v5, %v1042_v5 }
 0x1e6   :  { %1281 = vmatprep.mubr.bf16.mxu1 %v1077_v6 }
 0x1e7   :  { %1282 = vmatmul.mubr.bf16.vlgmr.msra.gmra.mrb[4].mxu1 %v1076_v8 }
 0x1e8   :  { %1665 = vmatpush3.bf16.msra.mxu1 %v1948_v7 }
 0x1e9   :  { %1666 = vmatprep.subr.bf16.mxu1 %v1949_v9 }
 0x1ec   :  { %1667 = vmatpush3.bf16.msra.mxu1 %v1950_v10 }
 0x1ed   :  { %1668 = vmatprep.subr.bf16.mxu1 %v1951_v11 }
 0x1f0   :  { %1669 = vmatpush3.bf16.msra.mxu1 %v1952_v12 }
 0x1f1   :  { %1670 = vmatprep.subr.bf16.mxu1 %v1953_v13 }
 0x1f4   :  { %1671 = vmatpush3.bf16.msra.mxu1 %v1954_v14 }
 0x1f5   :  { %1672 = vmatprep.subr.bf16.mxu1 %v1955_v15 }
 0x1f8   :  { %1673 = vmatpush3.bf16.msra.mxu1 %v1956_v16 }
 0x1f9   :  { %1674 = vmatprep.subr.bf16.mxu1 %v1957_v17 }
 0x1fc   :  { %1675 = vmatpush3.bf16.msra.mxu1 %v1958_v18 }
 0x1fd   :  { %1676 = vmatprep.subr.bf16.mxu1 %v1959_v19 }
 0x200   :  { %1677 = vmatpush3.bf16.msra.mxu1 %v1960_v20 }
 0x201   :  { %1678 = vmatprep.subr.bf16.mxu1 %v1961_v21 }
 0x204   :  { %1679 = vmatpush3.bf16.msra.mxu1 %v1962_v22 }
 0x2ba   :  { %v1283_v26 = vpop.f32.mrb[4].mxu1 }
 0x2bb   :  { %v1284_v27 = vadd.f32 %v1283_v26, %v1082_v24  ;;  %v1285_v28 = vpop.f32.mrb[5].mxu1 }
 0x2bc   :  { %v1286_v29 = vadd.f32 %v1285_v28, %v1086_v25  ;;  %v1287_v30 = vpop.f32.mrb[6].mxu1 }
 0x2bd   :  { %v1290_v31 = vmax.f32 %v1284_v27, 0.0  ;;  %v1288_v32 = vpop.f32.mrb[7].mxu1 }
 0x2be   :  { %v1291_v33 = vmax.f32 %v1286_v29, 0.0 }
 0x2bf   :  { %v1325_v35 = vpack.c.bf16 %v1290_v31, %v1290_v31 }
 0x2c0   :  { %v1326_v34 = vpack.c.bf16 %v1291_v33, %v1291_v33 }
 0x2c2   :  { %1461 = vmatprep.mubr.bf16.mxu1 %v1326_v34 }
 0x2c3   :  { %1462 = vmatmul.mubr.bf16.vlgmr.msra.gmra.mrb[8].mxu1 %v1325_v35 }
 0x396   :  { %v1680_v36 = vpop.f32.mrb[8].mxu1 }
 0x397   :  { %v1681_v38 = vpop.f32.mrb[9].mxu1 }
 0x398   :  { %v1682_v39 = vadd.f32 %v1681_v38, %v1680_v36  ;;  %v1683_v40 = vpop.f32.mrb[10].mxu1 }
 0x399   :  { %v1684_v41 = vpop.f32.mrb[11].mxu1 }
 0x39a   :  { %v1464_v42 = vadd.f32 %v1682_v39, %v1647_v37 }
 0x39c   :  { %1469 = vst [vmem:[#allocation10] sm:$0xff] %v1464_v42 }
 0x39d   :  { %2062 = shalt.err (!%p2059_p8)
}
 0x39e   :  { %s2063_s6 = scalar_lea.hbm %s2212_s7, 128 }
 0x39f   :  { %p2064_p9 = scmp.ne.s32.totalorder %s2212_s7, %s2063_s6  ;;  %p2067_p10 = scmp.lt.u32.totalorder %s2063_s6, %s2212_s7 }
 0x3a1   :  { %p2069_p11 = pnand %p2067_p10, %p2064_p9 }
 0x3a3   :  { %2072 = shalt.err (!%p2069_p11)
}
 0x3a4   :  { %1479 = dma.vmem_to_hbm [thread:$0]  %s1477_s30, 128, %s2212_s7, [#allocation4]  }
 0x3a5   :  { %2079 = dma.done.wait [#allocation4], 128  }
 0x3a6   :  { %2080 = vsyncadd [#allocation4], 4294967168 }
 0x3a7   :  { %1483 = vsyncpa [#allocation3], 1 }
 0x3a8   :  { %1484 = vsyncpa [#allocation6], 1 }
 0x3a9   :  { %1485 = vsyncpa [#allocation9], 1 }
 0x3aa   :  { %1486 = vsyncpa [#allocation4], 1 }

</bundles_post_ra>
